<compile_context>
chip_gen: v6e
topology: v6e:2x2x1
jax: 0.10.0
libtpu: 0.0.40
codegen_flags: <defaults>
</compile_context>

<pallas_src>
import jax
import jax.numpy as jnp
from jax.experimental import pallas as pl
from jax.experimental.pallas import tpu as pltpu

# ----------------------------- problem sizes -----------------------------
B = 2        # number of states in the PPO batch (list of HeteroData)
S = 16       # segment nodes per graph
I = 4        # intersections == action categories per state
FIN = 8      # in_features
H = 32       # hidden_dim
HEADS = 4    # GAT heads (concat=False -> mean over heads)
HH = HEADS * H       # 128 -> one full lane group
BS = B * S           # 32  folded batch*segment rows
BI = B * I           # 8   folded batch*intersection rows
HB = HEADS * BS      # 128 heads stacked along lanes for the batched softmax
LANES = 128

# activation-slab lane offsets
C_X = 0
C_ADJ = FIN
C_MEMB = FIN + BS

# weight-slab row offsets (all 8-aligned)
R_W1 = 0                 # (FIN, HH)   GAT layer-1 weights, head h in lanes h*H:(h+1)*H
R_W2 = 8                 # (H, HH)     GAT layer-2 weights
R_AD1 = 40               # (HEADS, HH) a_dst layer 1, head-block rows
R_AS1 = 48               # (HEADS, HH) a_src layer 1
R_AD2 = 56               # (HEADS, HH) a_dst layer 2
R_AS2 = 64               # (HEADS, HH) a_src layer 2
R_GB = 72                # 2 rows: GAT biases in lanes 0:H
R_WH1 = 80               # (H, 2H)  [actor | critic] hidden weights, lanes 0:2H
R_WH1B = 112             # 1 row:   hidden biases
R_WH2 = 120              # (2, 2H)  [actor out | critic out] output weights (transposed)
R_WH2B = 128             # 1 row:   output biases, lanes 0:2
R_BLK = 136              # (HB, HB) same-head-block indicator (softmax denominators on the MXU)
R_GRP = 264              # (BI, BI) same-state indicator (per-state logsumexp / entropy on the MXU)
WROWS = 272


# ----------------------------- fused Pallas kernel -----------------------------

def _gat_layer(feat, neg_tiled, blk_eq, w_all, a_dst_rows, a_src_rows, bias):
    """GATConv(heads=HEADS, concat=False) over ALL states & heads at once.

    feat:       (BS, Fin)       folded node features
    neg_tiled:  (BS, HEADS*BS)  additive edge mask, tiled per head block
    blk_eq:     (HB, HB)        1 iff same head block (segmented row sums via MXU)
    w_all:      (Fin, HEADS*H)  head-h weights in lane block h*H:(h+1)*H
    a_dst_rows: (HEADS, HEADS*H) row h = a_dst[h] in its lane block, zeros elsewhere
    a_src_rows: (HEADS, HEADS*H) likewise for a_src
    """
    hf = jnp.dot(feat, w_all, preferred_element_type=jnp.float32)             # (BS, HEADS*H)
    # ed[i, h] = a_dst[h] . h_i^(h)   ;   es[h, j] = a_src[h] . h_j^(h)
    ed = jax.lax.dot_general(hf, a_dst_rows,
                             dimension_numbers=(((1,), (1,)), ((), ())),
                             preferred_element_type=jnp.float32)              # (BS, HEADS)
    es = jax.lax.dot_general(a_src_rows, hf,
                             dimension_numbers=(((1,), (1,)), ((), ())),
                             preferred_element_type=jnp.float32)              # (HEADS, BS)

    # all heads stacked along lanes: e[i, h*BS + j] = ed[i, h] + es[h, j]
    e = jnp.concatenate([ed[:, hh:hh + 1] + es[hh:hh + 1, :] for hh in range(HEADS)],
                        axis=-1)                                              # (BS, HEADS*BS)
    e = jnp.where(e > 0, e, 0.2 * e) + neg_tiled                              # LeakyReLU(0.2) + edge mask
    # per-row constant shift (global over all head blocks) is exact for per-block softmax
    e = e - jnp.max(e, axis=-1, keepdims=True)
    p = jnp.exp(e)                                                            # masked entries -> 0
    denom = jnp.maximum(jnp.dot(p, blk_eq, preferred_element_type=jnp.float32), 1e-30)
    alpha = p / denom                                                         # exact division

    acc = None                                                                # sum over heads
    for hh in range(HEADS):
        part = jnp.dot(alpha[:, hh * BS:(hh + 1) * BS], hf[:, hh * H:(hh + 1) * H],
                       preferred_element_type=jnp.float32)                    # (BS, H)
        acc = part if acc is None else acc + part
    return acc * (1.0 / HEADS) + bias                                         # mean over heads + bias


def fused_ppo_kernel(act_ref, w_ref, out_ref):
    """GAT x2 -> mean pool -> (zero temporal) -> actor/critic -> Categorical stats, all states fused."""
    f32 = jnp.float32
    # ---- unpack activation slab ----
    x = act_ref[:, C_X:C_X + FIN]                         # (BS, FIN)
    negm = act_ref[:, C_ADJ:C_ADJ + BS]                   # (BS, BS) additive mask (0 / -1e9), block-diag
    memb_n = act_ref[0:BI, C_MEMB:C_MEMB + BS]            # (BI, BS) membership / count (block-diag)
    neg_tiled = jnp.concatenate([negm] * HEADS, axis=-1)  # (BS, HEADS*BS), hoisted for both layers

    # ---- unpack weight slab (static, 8-aligned row offsets) ----
    w1 = w_ref[R_W1:R_W1 + FIN, :]
    w2 = w_ref[R_W2:R_W2 + H, :]
    ad1 = w_ref[R_AD1:R_AD1 + HEADS, :]
    as1 = w_ref[R_AS1:R_AS1 + HEADS, :]
    ad2 = w_ref[R_AD2:R_AD2 + HEADS, :]
    as2 = w_ref[R_AS2:R_AS2 + HEADS, :]
    b1 = w_ref[R_GB:R_GB + 1, 0:H]
    b2 = w_ref[R_GB + 1:R_GB + 2, 0:H]
    wh1_w = w_ref[R_WH1:R_WH1 + H, 0:2 * H]               # (H, 2H)  [actor | critic] hidden
    wh1_b = w_ref[R_WH1B:R_WH1B + 1, 0:2 * H]             # (1, 2H)
    wh2_wt = w_ref[R_WH2:R_WH2 + 2, 0:2 * H]              # (2, 2H)  [actor out ; critic out]
    wh2_b = w_ref[R_WH2B:R_WH2B + 1, 0:2]                 # (1, 2)
    blk_eq = w_ref[R_BLK:R_BLK + HB, :]                   # (HB, HB)
    grp_eq = w_ref[R_GRP:R_GRP + BI, 0:BI]                # (BI, BI)

    # ---- spatial encoder: 2x GAT + ReLU, all states folded on sublanes ----
    h1 = jnp.maximum(_gat_layer(x, neg_tiled, blk_eq, w1, ad1, as1, b1), 0.0)   # (BS, H)
    h2 = jnp.maximum(_gat_layer(h1, neg_tiled, blk_eq, w2, ad2, as2, b2), 0.0)  # (BS, H)

    # per-intersection mean pool (1/count folded into memb_n host-side)
    sp = jnp.dot(memb_n, h2, preferred_element_type=f32)                        # (BI, H)

    # fused actor + critic MLPs (temporal half of the combined input == zeros -> dropped)
    hid = jnp.maximum(jnp.dot(sp, wh1_w, preferred_element_type=f32) + wh1_b, 0.0)   # (BI, 2H)
    lv = jax.lax.dot_general(hid, wh2_wt, dimension_numbers=(((1,), (1,)), ((), ())),
                             preferred_element_type=f32) + wh2_b                # (BI, 2): [logits | values]

    # Categorical(logits) per state (groups of I sublanes), batched via the same-state indicator
    logits_c = lv[:, 0:1]                                                        # (BI, 1)
    values_c = lv[:, 1:2]
    z = logits_c - jnp.max(logits_c)                                             # shared shift: exact per state
    ez = jnp.exp(z)
    ssum = jnp.dot(grp_eq, ez, preferred_element_type=f32)                       # per-state sum on each row
    logp = z - jnp.log(ssum)                                                     # (BI, 1) log_softmax
    pr = jnp.exp(logp)
    ent = -jnp.dot(grp_eq, pr * logp, preferred_element_type=f32)                # per-state entropy, per row

    # lane-dense output tile: lane0=logit lane1=value lane2=logp lane3=entropy
    lane = jax.lax.broadcasted_iota(jnp.int32, (BI, LANES), 1)
    out = (jnp.where(lane == 0, logits_c, 0.0)
           + jnp.where(lane == 1, values_c, 0.0)
           + jnp.where(lane == 2, logp, 0.0)
           + jnp.where(lane == 3, ent, 0.0))
    out_ref[...] = out.astype(out_ref.dtype)


# ----------------------------- pallas_call wrapper -----------------------------

def build_forward():
    fused = pl.pallas_call(
        fused_ppo_kernel,
        out_shape=jax.ShapeDtypeStruct((BI, LANES), jnp.float32),
        grid=(1,),
        in_specs=[
            pl.BlockSpec((BS, LANES), lambda g: (0, 0)),     # activation slab
            pl.BlockSpec((WROWS, LANES), lambda g: (0, 0)),  # weight slab
        ],
        out_specs=pl.BlockSpec((BI, LANES), lambda g: (0, 0)),
        compiler_params=pltpu.CompilerParams(dimension_semantics=("arbitrary",)),
        cost_estimate=pl.CostEstimate(flops=3_300_000, transcendentals=8400,
                                      bytes_accessed=160_000),
    )

    @jax.jit
    def ppo_forward(x, adj, memb, w_slab, sample_key):
        """PPOWrapper.forward over B states -> (actions, log_probs, entropy, values)."""
        # fold the batch onto sublanes: block-diagonal adjacency / membership keep states independent
        eye_b = jnp.eye(B, dtype=jnp.float32)
        xf = x.reshape(BS, FIN).astype(jnp.float32)
        adj_bd = (adj[:, :, None, :] * eye_b[:, None, :, None]).reshape(BS, BS)
        memb_bd = (memb[:, :, None, :] * eye_b[:, None, :, None]).reshape(BI, BS)
        negm = jnp.where(adj_bd > 0, 0.0, -1e9).astype(jnp.float32)
        cnt = jnp.maximum(jnp.sum(memb_bd, axis=-1, keepdims=True), 1.0)
        memb_n = (memb_bd / cnt).astype(jnp.float32)

        act = jnp.zeros((BS, LANES), jnp.float32)
        act = act.at[:, C_X:C_X + FIN].set(xf)
        act = act.at[:, C_ADJ:C_ADJ + BS].set(negm)
        act = act.at[0:BI, C_MEMB:C_MEMB + BS].set(memb_n)

        out = fused(act, w_slab)                       # (BI, 128)
        r = out.reshape(B, I, LANES)
        logits = r[:, :, 0]                            # (B, I) stacked logits.squeeze()
        values = r[:, :, 1]                            # (B, I) stacked value.squeeze()
        logp_all = r[:, :, 2]                          # (B, I) log_softmax(logits)
        entropy = r[:, 0, 3]                           # (B,)
        actions = jax.random.categorical(sample_key, logits, axis=-1)   # dist.sample()
        log_probs = jnp.take_along_axis(logp_all, actions[:, None], axis=-1)[:, 0]
        return actions, log_probs, entropy, values

    return ppo_forward


# ----------------------------- params: module layout -> packed slab -----------------------------

def init_params(key):
    """Deterministic params in the original module layout."""
    ks = jax.random.split(key, 10)

    def glorot(k, shape, fan_in, fan_out):
        limit = (6.0 / (fan_in + fan_out)) ** 0.5
        return jax.random.uniform(k, shape, jnp.float32, -limit, limit)

    gat = (
        glorot(ks[0], (HEADS, FIN, H), FIN, H),      # W per head, layer 1
        glorot(ks[1], (HEADS, H), H, 1),             # a_src, layer 1
        glorot(ks[2], (HEADS, H), H, 1),             # a_dst, layer 1
        jnp.zeros((1, H), jnp.float32),              # bias,  layer 1
        glorot(ks[3], (HEADS, H, H), H, H),          # W per head, layer 2
        glorot(ks[4], (HEADS, H), H, 1),
        glorot(ks[5], (HEADS, H), H, 1),
        jnp.zeros((1, H), jnp.float32),
    )
    actor = (
        glorot(ks[6], (2 * H, H), 2 * H, H), jnp.zeros((1, H), jnp.float32),
        glorot(ks[7], (H, 1), H, 1), jnp.zeros((1, 1), jnp.float32),
    )
    critic = (
        glorot(ks[8], (2 * H, H), 2 * H, H), jnp.zeros((1, H), jnp.float32),
        glorot(ks[9], (H, 1), H, 1), jnp.zeros((1, 1), jnp.float32),
    )
    return {"gat": gat, "actor": actor, "critic": critic}


def pack_weights(params):
    """Pack module-layout params (+ two constant indicators) into one lane-aligned weight slab."""
    w1, as1, ad1, b1, w2, as2, ad2, b2 = params["gat"]

    w1_all = jnp.transpose(w1, (1, 0, 2)).reshape(FIN, HH)       # head h -> lanes h*H:(h+1)*H
    w2_all = jnp.transpose(w2, (1, 0, 2)).reshape(H, HH)

    def head_rows(a):                                            # (HEADS, H) -> (HEADS, HH)
        rows = jnp.zeros((HEADS, HH), jnp.float32)
        for hh in range(HEADS):
            rows = rows.at[hh, hh * H:(hh + 1) * H].set(a[hh])
        return rows

    slab = jnp.zeros((WROWS, LANES), jnp.float32)
    slab = slab.at[R_W1:R_W1 + FIN, :].set(w1_all)
    slab = slab.at[R_W2:R_W2 + H, :].set(w2_all)
    slab = slab.at[R_AD1:R_AD1 + HEADS, :].set(head_rows(ad1))
    slab = slab.at[R_AS1:R_AS1 + HEADS, :].set(head_rows(as1))
    slab = slab.at[R_AD2:R_AD2 + HEADS, :].set(head_rows(ad2))
    slab = slab.at[R_AS2:R_AS2 + HEADS, :].set(head_rows(as2))
    slab = slab.at[R_GB, 0:H].set(b1[0])
    slab = slab.at[R_GB + 1, 0:H].set(b2[0])

    aw1, ab1, aw2, ab2 = params["actor"]
    cw1, cb1, cw2, cb2 = params["critic"]
    # temporal half of the (2H, H) input weight multiplies exact zeros -> drop rows H:2H
    wh1_w = jnp.concatenate([aw1[:H, :], cw1[:H, :]], axis=1)    # (H, 2H)
    wh1_b = jnp.concatenate([ab1[0], cb1[0]])                    # (2H,)
    slab = slab.at[R_WH1:R_WH1 + H, 0:2 * H].set(wh1_w)
    slab = slab.at[R_WH1B, 0:2 * H].set(wh1_b)

    wh2_wt = jnp.zeros((2, 2 * H), jnp.float32)                  # block-diag output weights (transposed)
    wh2_wt = wh2_wt.at[0, 0:H].set(aw2[:, 0])
    wh2_wt = wh2_wt.at[1, H:2 * H].set(cw2[:, 0])
    slab = slab.at[R_WH2:R_WH2 + 2, 0:2 * H].set(wh2_wt)
    slab = slab.at[R_WH2B, 0].set(ab2[0, 0])
    slab = slab.at[R_WH2B, 1].set(cb2[0, 0])

    # constant indicators: same head block (segmented softmax sums), same state (dist stats)
    ridx = jnp.arange(HB) // BS
    slab = slab.at[R_BLK:R_BLK + HB, :].set((ridx[:, None] == ridx[None, :]).astype(jnp.float32))
    gidx = jnp.arange(BI) // I
    slab = slab.at[R_GRP:R_GRP + BI, 0:BI].set((gidx[:, None] == gidx[None, :]).astype(jnp.float32))
    return slab


# ----------------------------- deterministic example -----------------------------

if __name__ == "__main__":
    key = jax.random.PRNGKey(0)
    k_data, k_param, k_sample = jax.random.split(key, 3)

    # segment node features for B synthetic graphs
    x = jax.random.normal(k_data, (B, S, FIN), dtype=jnp.float32)

    # directed ring among segments: edge j -> (j+1) % S ; adjacency also carries self-loops
    src = jnp.arange(S)
    dst = (src + 1) % S
    adj_single = jnp.eye(S, dtype=jnp.float32).at[dst, src].set(1.0)   # adj[i, j] = 1 for edge j->i
    adj = jnp.tile(adj_single[None], (B, 1, 1))

    # intersection k is fed by segments [4k, 4k+4)
    memb_single = jnp.repeat(jnp.eye(I, dtype=jnp.float32), S // I, axis=1)   # (I, S)
    memb = jnp.tile(memb_single[None], (B, 1, 1))

    params = init_params(k_param)
    w_slab = pack_weights(params)

    forward = build_forward()
    actions, log_probs, entropy, values = forward(x, adj, memb, w_slab, k_sample)
    jax.block_until_ready((actions, log_probs, entropy, values))

    assert actions.shape == (B,) and log_probs.shape == (B,)
    assert entropy.shape == (B,) and values.shape == (B, I)
    assert bool(jnp.all((actions >= 0) & (actions < I)))
    assert bool(jnp.all(jnp.isfinite(log_probs))) and bool(jnp.all(jnp.isfinite(values)))
    assert bool(jnp.all(entropy >= -1e-3)) and bool(jnp.all(entropy <= jnp.log(float(I)) + 1e-3))
    print("KERNEL_OK")
</pallas_src>

<mosaic_0001>
module attributes {stable_mosaic.version = 11 : i64} {
  func.func @fused_ppo_kernel(%arg0: i32, %arg1: memref<32x128xf32, #tpu.memory_space<vmem>>, %arg2: memref<272x128xf32, #tpu.memory_space<vmem>>, %arg3: memref<8x128xf32, #tpu.memory_space<vmem>>) attributes {dimension_semantics = [#tpu.dimension_semantics<arbitrary>], iteration_bounds = array<i64: 1>, scalar_prefetch = 0 : i64, scratch_operands = 0 : i64, tpu.core_type = #tpu.core_type<tc>, window_params = [{pipeline_mode = #tpu.pipeline_mode<synchronous>, transform_indices = @transform_0, window_bounds = array<i64: 32, 128>}, {pipeline_mode = #tpu.pipeline_mode<synchronous>, transform_indices = @transform_1, window_bounds = array<i64: 272, 128>}, {pipeline_mode = #tpu.pipeline_mode<synchronous>, transform_indices = @transform_2, window_bounds = array<i64: 8, 128>}]} {
    %c0 = arith.constant 0 : index
    %c0_0 = arith.constant 0 : index
    %0 = vector.load %arg1[%c0, %c0_0] : memref<32x128xf32, #tpu.memory_space<vmem>>, vector<32x8xf32>
    %c0_1 = arith.constant 0 : index
    %c8 = arith.constant 8 : index
    %1 = vector.load %arg1[%c0_1, %c8] : memref<32x128xf32, #tpu.memory_space<vmem>>, vector<32x32xf32>
    %c0_2 = arith.constant 0 : index
    %c40 = arith.constant 40 : index
    %2 = vector.load %arg1[%c0_2, %c40] : memref<32x128xf32, #tpu.memory_space<vmem>>, vector<8x32xf32>
    %3 = tpu.concatenate %1, %1, %1, %1 in 1 : vector<32x32xf32>, vector<32x32xf32>, vector<32x32xf32>, vector<32x32xf32> -> vector<32x128xf32>
    %c0_3 = arith.constant 0 : index
    %c0_4 = arith.constant 0 : index
    %4 = vector.load %arg2[%c0_3, %c0_4] : memref<272x128xf32, #tpu.memory_space<vmem>>, vector<8x128xf32>
    %c8_5 = arith.constant 8 : index
    %c0_6 = arith.constant 0 : index
    %5 = vector.load %arg2[%c8_5, %c0_6] : memref<272x128xf32, #tpu.memory_space<vmem>>, vector<32x128xf32>
    %c40_7 = arith.constant 40 : index
    %c0_8 = arith.constant 0 : index
    %6 = vector.load %arg2[%c40_7, %c0_8] : memref<272x128xf32, #tpu.memory_space<vmem>>, vector<4x128xf32>
    %c48 = arith.constant 48 : index
    %c0_9 = arith.constant 0 : index
    %7 = vector.load %arg2[%c48, %c0_9] : memref<272x128xf32, #tpu.memory_space<vmem>>, vector<4x128xf32>
    %c56 = arith.constant 56 : index
    %c0_10 = arith.constant 0 : index
    %8 = vector.load %arg2[%c56, %c0_10] : memref<272x128xf32, #tpu.memory_space<vmem>>, vector<4x128xf32>
    %c64 = arith.constant 64 : index
    %c0_11 = arith.constant 0 : index
    %9 = vector.load %arg2[%c64, %c0_11] : memref<272x128xf32, #tpu.memory_space<vmem>>, vector<4x128xf32>
    %c72 = arith.constant 72 : index
    %c0_12 = arith.constant 0 : index
    %10 = vector.load %arg2[%c72, %c0_12] : memref<272x128xf32, #tpu.memory_space<vmem>>, vector<1x32xf32>
    %c73 = arith.constant 73 : index
    %c0_13 = arith.constant 0 : index
    %11 = vector.load %arg2[%c73, %c0_13] : memref<272x128xf32, #tpu.memory_space<vmem>>, vector<1x32xf32>
    %c80 = arith.constant 80 : index
    %c0_14 = arith.constant 0 : index
    %12 = vector.load %arg2[%c80, %c0_14] : memref<272x128xf32, #tpu.memory_space<vmem>>, vector<32x64xf32>
    %c112 = arith.constant 112 : index
    %c0_15 = arith.constant 0 : index
    %13 = vector.load %arg2[%c112, %c0_15] : memref<272x128xf32, #tpu.memory_space<vmem>>, vector<1x64xf32>
    %c120 = arith.constant 120 : index
    %c0_16 = arith.constant 0 : index
    %14 = vector.load %arg2[%c120, %c0_16] : memref<272x128xf32, #tpu.memory_space<vmem>>, vector<2x64xf32>
    %c128 = arith.constant 128 : index
    %c0_17 = arith.constant 0 : index
    %15 = vector.load %arg2[%c128, %c0_17] : memref<272x128xf32, #tpu.memory_space<vmem>>, vector<1x2xf32>
    %c136 = arith.constant 136 : index
    %c0_18 = arith.constant 0 : index
    %16 = vector.load %arg2[%c136, %c0_18] : memref<272x128xf32, #tpu.memory_space<vmem>>, vector<128x128xf32>
    %c264 = arith.constant 264 : index
    %c0_19 = arith.constant 0 : index
    %17 = vector.load %arg2[%c264, %c0_19] : memref<272x128xf32, #tpu.memory_space<vmem>>, vector<8x8xf32>
    %cst = arith.constant dense<0.000000e+00> : vector<32x128xf32>
    %18 = tpu.matmul %0, %4, %cst {dimension_numbers = #tpu.dot_dimension_numbers<[1], [0], [0], [1], [0, 0, 1, 1], [], []>} : vector<32x8xf32>, vector<8x128xf32>, vector<32x128xf32> -> vector<32x128xf32>
    %cst_20 = arith.constant dense<0.000000e+00> : vector<32x4xf32>
    %19 = tpu.matmul %18, %6, %cst_20 {dimension_numbers = #tpu.dot_dimension_numbers<[1], [1], [0], [0], [0, 0, 1, 0], [], []>} : vector<32x128xf32>, vector<4x128xf32>, vector<32x4xf32> -> vector<32x4xf32>
    %cst_21 = arith.constant dense<0.000000e+00> : vector<4x32xf32>
    %20 = tpu.matmul %7, %18, %cst_21 {dimension_numbers = #tpu.dot_dimension_numbers<[1], [1], [0], [0], [0, 0, 1, 0], [], []>} : vector<4x128xf32>, vector<32x128xf32>, vector<4x32xf32> -> vector<4x32xf32>
    %21 = vector.extract_strided_slice %19 {offsets = [0, 0], sizes = [32, 1], strides = [1, 1]} : vector<32x4xf32> to vector<32x1xf32>
    %22 = vector.extract_strided_slice %20 {offsets = [0, 0], sizes = [1, 32], strides = [1, 1]} : vector<4x32xf32> to vector<1x32xf32>
    %23 = vector.broadcast %21 : vector<32x1xf32> to vector<32x32xf32>
    %24 = vector.broadcast %22 : vector<1x32xf32> to vector<32x32xf32>
    %25 = arith.addf %23, %24 : vector<32x32xf32>
    %26 = vector.extract_strided_slice %19 {offsets = [0, 1], sizes = [32, 1], strides = [1, 1]} : vector<32x4xf32> to vector<32x1xf32>
    %27 = vector.extract_strided_slice %20 {offsets = [1, 0], sizes = [1, 32], strides = [1, 1]} : vector<4x32xf32> to vector<1x32xf32>
    %28 = vector.broadcast %26 : vector<32x1xf32> to vector<32x32xf32>
    %29 = vector.broadcast %27 : vector<1x32xf32> to vector<32x32xf32>
    %30 = arith.addf %28, %29 : vector<32x32xf32>
    %31 = vector.extract_strided_slice %19 {offsets = [0, 2], sizes = [32, 1], strides = [1, 1]} : vector<32x4xf32> to vector<32x1xf32>
    %32 = vector.extract_strided_slice %20 {offsets = [2, 0], sizes = [1, 32], strides = [1, 1]} : vector<4x32xf32> to vector<1x32xf32>
    %33 = vector.broadcast %31 : vector<32x1xf32> to vector<32x32xf32>
    %34 = vector.broadcast %32 : vector<1x32xf32> to vector<32x32xf32>
    %35 = arith.addf %33, %34 : vector<32x32xf32>
    %36 = vector.extract_strided_slice %19 {offsets = [0, 3], sizes = [32, 1], strides = [1, 1]} : vector<32x4xf32> to vector<32x1xf32>
    %37 = vector.extract_strided_slice %20 {offsets = [3, 0], sizes = [1, 32], strides = [1, 1]} : vector<4x32xf32> to vector<1x32xf32>
    %38 = vector.broadcast %36 : vector<32x1xf32> to vector<32x32xf32>
    %39 = vector.broadcast %37 : vector<1x32xf32> to vector<32x32xf32>
    %40 = arith.addf %38, %39 : vector<32x32xf32>
    %41 = tpu.concatenate %25, %30, %35, %40 in 1 : vector<32x32xf32>, vector<32x32xf32>, vector<32x32xf32>, vector<32x32xf32> -> vector<32x128xf32>
    %cst_22 = arith.constant 0.000000e+00 : f32
    %42 = vector.broadcast %cst_22 : f32 to vector<32x128xf32>
    %43 = arith.cmpf ogt, %41, %42 : vector<32x128xf32>
    %cst_23 = arith.constant 2.000000e-01 : f32
    %44 = vector.broadcast %cst_23 : f32 to vector<32x128xf32>
    %45 = arith.mulf %44, %41 : vector<32x128xf32>
    %46 = arith.select %43, %41, %45 : vector<32x128xi1>, vector<32x128xf32>
    %47 = arith.addf %46, %3 : vector<32x128xf32>
    %cst_24 = arith.constant dense<0xFF800000> : vector<32xf32>
    %48 = vector.multi_reduction <maximumf>, %47, %cst_24 [1] : vector<32x128xf32> to vector<32xf32>
    %49 = vector.shape_cast %48 : vector<32xf32> to vector<32x1xf32>
    %50 = vector.broadcast %49 : vector<32x1xf32> to vector<32x128xf32>
    %51 = arith.subf %47, %50 : vector<32x128xf32>
    %52 = math.exp %51 : vector<32x128xf32>
    %cst_25 = arith.constant dense<0.000000e+00> : vector<32x128xf32>
    %53 = tpu.matmul %52, %16, %cst_25 {dimension_numbers = #tpu.dot_dimension_numbers<[1], [0], [0], [1], [0, 0, 1, 1], [], []>} : vector<32x128xf32>, vector<128x128xf32>, vector<32x128xf32> -> vector<32x128xf32>
    %cst_26 = arith.constant 1.000000e-30 : f32
    %54 = vector.broadcast %cst_26 : f32 to vector<32x128xf32>
    %55 = arith.maximumf %53, %54 : vector<32x128xf32>
    %56 = arith.divf %52, %55 : vector<32x128xf32>
    %57 = vector.extract_strided_slice %56 {offsets = [0, 0], sizes = [32, 32], strides = [1, 1]} : vector<32x128xf32> to vector<32x32xf32>
    %58 = vector.extract_strided_slice %18 {offsets = [0, 0], sizes = [32, 32], strides = [1, 1]} : vector<32x128xf32> to vector<32x32xf32>
    %cst_27 = arith.constant dense<0.000000e+00> : vector<32x32xf32>
    %59 = tpu.matmul %57, %58, %cst_27 {dimension_numbers = #tpu.dot_dimension_numbers<[1], [0], [0], [1], [0, 0, 1, 1], [], []>} : vector<32x32xf32>, vector<32x32xf32>, vector<32x32xf32> -> vector<32x32xf32>
    %60 = vector.extract_strided_slice %56 {offsets = [0, 32], sizes = [32, 32], strides = [1, 1]} : vector<32x128xf32> to vector<32x32xf32>
    %61 = vector.extract_strided_slice %18 {offsets = [0, 32], sizes = [32, 32], strides = [1, 1]} : vector<32x128xf32> to vector<32x32xf32>
    %cst_28 = arith.constant dense<0.000000e+00> : vector<32x32xf32>
    %62 = tpu.matmul %60, %61, %cst_28 {dimension_numbers = #tpu.dot_dimension_numbers<[1], [0], [0], [1], [0, 0, 1, 1], [], []>} : vector<32x32xf32>, vector<32x32xf32>, vector<32x32xf32> -> vector<32x32xf32>
    %63 = arith.addf %59, %62 : vector<32x32xf32>
    %64 = vector.extract_strided_slice %56 {offsets = [0, 64], sizes = [32, 32], strides = [1, 1]} : vector<32x128xf32> to vector<32x32xf32>
    %65 = vector.extract_strided_slice %18 {offsets = [0, 64], sizes = [32, 32], strides = [1, 1]} : vector<32x128xf32> to vector<32x32xf32>
    %cst_29 = arith.constant dense<0.000000e+00> : vector<32x32xf32>
    %66 = tpu.matmul %64, %65, %cst_29 {dimension_numbers = #tpu.dot_dimension_numbers<[1], [0], [0], [1], [0, 0, 1, 1], [], []>} : vector<32x32xf32>, vector<32x32xf32>, vector<32x32xf32> -> vector<32x32xf32>
    %67 = arith.addf %63, %66 : vector<32x32xf32>
    %68 = vector.extract_strided_slice %56 {offsets = [0, 96], sizes = [32, 32], strides = [1, 1]} : vector<32x128xf32> to vector<32x32xf32>
    %69 = vector.extract_strided_slice %18 {offsets = [0, 96], sizes = [32, 32], strides = [1, 1]} : vector<32x128xf32> to vector<32x32xf32>
    %cst_30 = arith.constant dense<0.000000e+00> : vector<32x32xf32>
    %70 = tpu.matmul %68, %69, %cst_30 {dimension_numbers = #tpu.dot_dimension_numbers<[1], [0], [0], [1], [0, 0, 1, 1], [], []>} : vector<32x32xf32>, vector<32x32xf32>, vector<32x32xf32> -> vector<32x32xf32>
    %71 = arith.addf %67, %70 : vector<32x32xf32>
    %cst_31 = arith.constant 2.500000e-01 : f32
    %72 = vector.broadcast %cst_31 : f32 to vector<32x32xf32>
    %73 = arith.mulf %71, %72 : vector<32x32xf32>
    %74 = vector.broadcast %10 : vector<1x32xf32> to vector<32x32xf32>
    %75 = arith.addf %73, %74 : vector<32x32xf32>
    %cst_32 = arith.constant 0.000000e+00 : f32
    %76 = vector.broadcast %cst_32 : f32 to vector<32x32xf32>
    %77 = arith.maximumf %75, %76 : vector<32x32xf32>
    %cst_33 = arith.constant dense<0.000000e+00> : vector<32x128xf32>
    %78 = tpu.matmul %77, %5, %cst_33 {dimension_numbers = #tpu.dot_dimension_numbers<[1], [0], [0], [1], [0, 0, 1, 1], [], []>} : vector<32x32xf32>, vector<32x128xf32>, vector<32x128xf32> -> vector<32x128xf32>
    %cst_34 = arith.constant dense<0.000000e+00> : vector<32x4xf32>
    %79 = tpu.matmul %78, %8, %cst_34 {dimension_numbers = #tpu.dot_dimension_numbers<[1], [1], [0], [0], [0, 0, 1, 0], [], []>} : vector<32x128xf32>, vector<4x128xf32>, vector<32x4xf32> -> vector<32x4xf32>
    %cst_35 = arith.constant dense<0.000000e+00> : vector<4x32xf32>
    %80 = tpu.matmul %9, %78, %cst_35 {dimension_numbers = #tpu.dot_dimension_numbers<[1], [1], [0], [0], [0, 0, 1, 0], [], []>} : vector<4x128xf32>, vector<32x128xf32>, vector<4x32xf32> -> vector<4x32xf32>
    %81 = vector.extract_strided_slice %79 {offsets = [0, 0], sizes = [32, 1], strides = [1, 1]} : vector<32x4xf32> to vector<32x1xf32>
    %82 = vector.extract_strided_slice %80 {offsets = [0, 0], sizes = [1, 32], strides = [1, 1]} : vector<4x32xf32> to vector<1x32xf32>
    %83 = vector.broadcast %81 : vector<32x1xf32> to vector<32x32xf32>
    %84 = vector.broadcast %82 : vector<1x32xf32> to vector<32x32xf32>
    %85 = arith.addf %83, %84 : vector<32x32xf32>
    %86 = vector.extract_strided_slice %79 {offsets = [0, 1], sizes = [32, 1], strides = [1, 1]} : vector<32x4xf32> to vector<32x1xf32>
    %87 = vector.extract_strided_slice %80 {offsets = [1, 0], sizes = [1, 32], strides = [1, 1]} : vector<4x32xf32> to vector<1x32xf32>
    %88 = vector.broadcast %86 : vector<32x1xf32> to vector<32x32xf32>
    %89 = vector.broadcast %87 : vector<1x32xf32> to vector<32x32xf32>
    %90 = arith.addf %88, %89 : vector<32x32xf32>
    %91 = vector.extract_strided_slice %79 {offsets = [0, 2], sizes = [32, 1], strides = [1, 1]} : vector<32x4xf32> to vector<32x1xf32>
    %92 = vector.extract_strided_slice %80 {offsets = [2, 0], sizes = [1, 32], strides = [1, 1]} : vector<4x32xf32> to vector<1x32xf32>
    %93 = vector.broadcast %91 : vector<32x1xf32> to vector<32x32xf32>
    %94 = vector.broadcast %92 : vector<1x32xf32> to vector<32x32xf32>
    %95 = arith.addf %93, %94 : vector<32x32xf32>
    %96 = vector.extract_strided_slice %79 {offsets = [0, 3], sizes = [32, 1], strides = [1, 1]} : vector<32x4xf32> to vector<32x1xf32>
    %97 = vector.extract_strided_slice %80 {offsets = [3, 0], sizes = [1, 32], strides = [1, 1]} : vector<4x32xf32> to vector<1x32xf32>
    %98 = vector.broadcast %96 : vector<32x1xf32> to vector<32x32xf32>
    %99 = vector.broadcast %97 : vector<1x32xf32> to vector<32x32xf32>
    %100 = arith.addf %98, %99 : vector<32x32xf32>
    %101 = tpu.concatenate %85, %90, %95, %100 in 1 : vector<32x32xf32>, vector<32x32xf32>, vector<32x32xf32>, vector<32x32xf32> -> vector<32x128xf32>
    %cst_36 = arith.constant 0.000000e+00 : f32
    %102 = vector.broadcast %cst_36 : f32 to vector<32x128xf32>
    %103 = arith.cmpf ogt, %101, %102 : vector<32x128xf32>
    %cst_37 = arith.constant 2.000000e-01 : f32
    %104 = vector.broadcast %cst_37 : f32 to vector<32x128xf32>
    %105 = arith.mulf %104, %101 : vector<32x128xf32>
    %106 = arith.select %103, %101, %105 : vector<32x128xi1>, vector<32x128xf32>
    %107 = arith.addf %106, %3 : vector<32x128xf32>
    %cst_38 = arith.constant dense<0xFF800000> : vector<32xf32>
    %108 = vector.multi_reduction <maximumf>, %107, %cst_38 [1] : vector<32x128xf32> to vector<32xf32>
    %109 = vector.shape_cast %108 : vector<32xf32> to vector<32x1xf32>
    %110 = vector.broadcast %109 : vector<32x1xf32> to vector<32x128xf32>
    %111 = arith.subf %107, %110 : vector<32x128xf32>
    %112 = math.exp %111 : vector<32x128xf32>
    %cst_39 = arith.constant dense<0.000000e+00> : vector<32x128xf32>
    %113 = tpu.matmul %112, %16, %cst_39 {dimension_numbers = #tpu.dot_dimension_numbers<[1], [0], [0], [1], [0, 0, 1, 1], [], []>} : vector<32x128xf32>, vector<128x128xf32>, vector<32x128xf32> -> vector<32x128xf32>
    %cst_40 = arith.constant 1.000000e-30 : f32
    %114 = vector.broadcast %cst_40 : f32 to vector<32x128xf32>
    %115 = arith.maximumf %113, %114 : vector<32x128xf32>
    %116 = arith.divf %112, %115 : vector<32x128xf32>
    %117 = vector.extract_strided_slice %116 {offsets = [0, 0], sizes = [32, 32], strides = [1, 1]} : vector<32x128xf32> to vector<32x32xf32>
    %118 = vector.extract_strided_slice %78 {offsets = [0, 0], sizes = [32, 32], strides = [1, 1]} : vector<32x128xf32> to vector<32x32xf32>
    %cst_41 = arith.constant dense<0.000000e+00> : vector<32x32xf32>
    %119 = tpu.matmul %117, %118, %cst_41 {dimension_numbers = #tpu.dot_dimension_numbers<[1], [0], [0], [1], [0, 0, 1, 1], [], []>} : vector<32x32xf32>, vector<32x32xf32>, vector<32x32xf32> -> vector<32x32xf32>
    %120 = vector.extract_strided_slice %116 {offsets = [0, 32], sizes = [32, 32], strides = [1, 1]} : vector<32x128xf32> to vector<32x32xf32>
    %121 = vector.extract_strided_slice %78 {offsets = [0, 32], sizes = [32, 32], strides = [1, 1]} : vector<32x128xf32> to vector<32x32xf32>
    %cst_42 = arith.constant dense<0.000000e+00> : vector<32x32xf32>
    %122 = tpu.matmul %120, %121, %cst_42 {dimension_numbers = #tpu.dot_dimension_numbers<[1], [0], [0], [1], [0, 0, 1, 1], [], []>} : vector<32x32xf32>, vector<32x32xf32>, vector<32x32xf32> -> vector<32x32xf32>
    %123 = arith.addf %119, %122 : vector<32x32xf32>
    %124 = vector.extract_strided_slice %116 {offsets = [0, 64], sizes = [32, 32], strides = [1, 1]} : vector<32x128xf32> to vector<32x32xf32>
    %125 = vector.extract_strided_slice %78 {offsets = [0, 64], sizes = [32, 32], strides = [1, 1]} : vector<32x128xf32> to vector<32x32xf32>
    %cst_43 = arith.constant dense<0.000000e+00> : vector<32x32xf32>
    %126 = tpu.matmul %124, %125, %cst_43 {dimension_numbers = #tpu.dot_dimension_numbers<[1], [0], [0], [1], [0, 0, 1, 1], [], []>} : vector<32x32xf32>, vector<32x32xf32>, vector<32x32xf32> -> vector<32x32xf32>
    %127 = arith.addf %123, %126 : vector<32x32xf32>
    %128 = vector.extract_strided_slice %116 {offsets = [0, 96], sizes = [32, 32], strides = [1, 1]} : vector<32x128xf32> to vector<32x32xf32>
    %129 = vector.extract_strided_slice %78 {offsets = [0, 96], sizes = [32, 32], strides = [1, 1]} : vector<32x128xf32> to vector<32x32xf32>
    %cst_44 = arith.constant dense<0.000000e+00> : vector<32x32xf32>
    %130 = tpu.matmul %128, %129, %cst_44 {dimension_numbers = #tpu.dot_dimension_numbers<[1], [0], [0], [1], [0, 0, 1, 1], [], []>} : vector<32x32xf32>, vector<32x32xf32>, vector<32x32xf32> -> vector<32x32xf32>
    %131 = arith.addf %127, %130 : vector<32x32xf32>
    %cst_45 = arith.constant 2.500000e-01 : f32
    %132 = vector.broadcast %cst_45 : f32 to vector<32x32xf32>
    %133 = arith.mulf %131, %132 : vector<32x32xf32>
    %134 = vector.broadcast %11 : vector<1x32xf32> to vector<32x32xf32>
    %135 = arith.addf %133, %134 : vector<32x32xf32>
    %cst_46 = arith.constant 0.000000e+00 : f32
    %136 = vector.broadcast %cst_46 : f32 to vector<32x32xf32>
    %137 = arith.maximumf %135, %136 : vector<32x32xf32>
    %cst_47 = arith.constant dense<0.000000e+00> : vector<8x32xf32>
    %138 = tpu.matmul %2, %137, %cst_47 {dimension_numbers = #tpu.dot_dimension_numbers<[1], [0], [0], [1], [0, 0, 1, 1], [], []>} : vector<8x32xf32>, vector<32x32xf32>, vector<8x32xf32> -> vector<8x32xf32>
    %cst_48 = arith.constant dense<0.000000e+00> : vector<8x64xf32>
    %139 = tpu.matmul %138, %12, %cst_48 {dimension_numbers = #tpu.dot_dimension_numbers<[1], [0], [0], [1], [0, 0, 1, 1], [], []>} : vector<8x32xf32>, vector<32x64xf32>, vector<8x64xf32> -> vector<8x64xf32>
    %140 = vector.broadcast %13 : vector<1x64xf32> to vector<8x64xf32>
    %141 = arith.addf %139, %140 : vector<8x64xf32>
    %cst_49 = arith.constant 0.000000e+00 : f32
    %142 = vector.broadcast %cst_49 : f32 to vector<8x64xf32>
    %143 = arith.maximumf %141, %142 : vector<8x64xf32>
    %cst_50 = arith.constant dense<0.000000e+00> : vector<8x2xf32>
    %144 = tpu.matmul %143, %14, %cst_50 {dimension_numbers = #tpu.dot_dimension_numbers<[1], [1], [0], [0], [0, 0, 1, 0], [], []>} : vector<8x64xf32>, vector<2x64xf32>, vector<8x2xf32> -> vector<8x2xf32>
    %145 = vector.broadcast %15 : vector<1x2xf32> to vector<8x2xf32>
    %146 = arith.addf %144, %145 : vector<8x2xf32>
    %147 = vector.extract_strided_slice %146 {offsets = [0, 0], sizes = [8, 1], strides = [1, 1]} : vector<8x2xf32> to vector<8x1xf32>
    %148 = vector.extract_strided_slice %146 {offsets = [0, 1], sizes = [8, 1], strides = [1, 1]} : vector<8x2xf32> to vector<8x1xf32>
    %149 = vector.shape_cast %147 : vector<8x1xf32> to vector<1x8x1xf32>
    %cst_51 = arith.constant dense<0xFF800000> : vector<1xf32>
    %150 = vector.multi_reduction <maximumf>, %149, %cst_51 [1, 2] : vector<1x8x1xf32> to vector<1xf32>
    %151 = vector.shape_cast %150 : vector<1xf32> to vector<1x1x1xf32>
    %152 = vector.extract %151[0, 0, 0] : f32 from vector<1x1x1xf32>
    %153 = vector.broadcast %152 : f32 to vector<8x1xf32>
    %154 = arith.subf %147, %153 : vector<8x1xf32>
    %155 = math.exp %154 : vector<8x1xf32>
    %cst_52 = arith.constant dense<0.000000e+00> : vector<8x1xf32>
    %156 = tpu.matmul %17, %155, %cst_52 {dimension_numbers = #tpu.dot_dimension_numbers<[1], [0], [0], [1], [0, 0, 1, 1], [], []>} : vector<8x8xf32>, vector<8x1xf32>, vector<8x1xf32> -> vector<8x1xf32>
    %157 = math.log %156 : vector<8x1xf32>
    %158 = arith.subf %154, %157 : vector<8x1xf32>
    %159 = math.exp %158 : vector<8x1xf32>
    %160 = arith.mulf %159, %158 : vector<8x1xf32>
    %cst_53 = arith.constant dense<0.000000e+00> : vector<8x1xf32>
    %161 = tpu.matmul %17, %160, %cst_53 {dimension_numbers = #tpu.dot_dimension_numbers<[1], [0], [0], [1], [0, 0, 1, 1], [], []>} : vector<8x8xf32>, vector<8x1xf32>, vector<8x1xf32> -> vector<8x1xf32>
    %cst_54 = arith.constant 0.000000e+00 : f32
    %162 = vector.broadcast %cst_54 : f32 to vector<8x1xf32>
    %163 = arith.subf %162, %161 : vector<8x1xf32>
    %164 = tpu.iota {dimensions = array<i32: 1>} : vector<8x128xi32>
    %c0_i32 = arith.constant 0 : i32
    %165 = vector.broadcast %c0_i32 : i32 to vector<8x128xi32>
    %166 = arith.cmpi eq, %164, %165 : vector<8x128xi32>
    %cst_55 = arith.constant 0.000000e+00 : f32
    %167 = vector.shape_cast %147 : vector<8x1xf32> to vector<8x1xf32>
    %168 = vector.broadcast %167 : vector<8x1xf32> to vector<8x128xf32>
    %169 = vector.broadcast %cst_55 : f32 to vector<8x128xf32>
    %170 = arith.select %166, %168, %169 : vector<8x128xi1>, vector<8x128xf32>
    %c1_i32 = arith.constant 1 : i32
    %171 = vector.broadcast %c1_i32 : i32 to vector<8x128xi32>
    %172 = arith.cmpi eq, %164, %171 : vector<8x128xi32>
    %cst_56 = arith.constant 0.000000e+00 : f32
    %173 = vector.shape_cast %148 : vector<8x1xf32> to vector<8x1xf32>
    %174 = vector.broadcast %173 : vector<8x1xf32> to vector<8x128xf32>
    %175 = vector.broadcast %cst_56 : f32 to vector<8x128xf32>
    %176 = arith.select %172, %174, %175 : vector<8x128xi1>, vector<8x128xf32>
    %177 = arith.addf %170, %176 : vector<8x128xf32>
    %c2_i32 = arith.constant 2 : i32
    %178 = vector.broadcast %c2_i32 : i32 to vector<8x128xi32>
    %179 = arith.cmpi eq, %164, %178 : vector<8x128xi32>
    %cst_57 = arith.constant 0.000000e+00 : f32
    %180 = vector.shape_cast %158 : vector<8x1xf32> to vector<8x1xf32>
    %181 = vector.broadcast %180 : vector<8x1xf32> to vector<8x128xf32>
    %182 = vector.broadcast %cst_57 : f32 to vector<8x128xf32>
    %183 = arith.select %179, %181, %182 : vector<8x128xi1>, vector<8x128xf32>
    %184 = arith.addf %177, %183 : vector<8x128xf32>
    %c3_i32 = arith.constant 3 : i32
    %185 = vector.broadcast %c3_i32 : i32 to vector<8x128xi32>
    %186 = arith.cmpi eq, %164, %185 : vector<8x128xi32>
    %cst_58 = arith.constant 0.000000e+00 : f32
    %187 = vector.shape_cast %163 : vector<8x1xf32> to vector<8x1xf32>
    %188 = vector.broadcast %187 : vector<8x1xf32> to vector<8x128xf32>
    %189 = vector.broadcast %cst_58 : f32 to vector<8x128xf32>
    %190 = arith.select %186, %188, %189 : vector<8x128xi1>, vector<8x128xf32>
    %191 = arith.addf %184, %190 : vector<8x128xf32>
    %c0_59 = arith.constant 0 : index
    %c0_60 = arith.constant 0 : index
    %192 = vector.load %arg3[%c0_59, %c0_60] : memref<8x128xf32, #tpu.memory_space<vmem>>, vector<8x128xf32>
    tpu.vector_store %arg3[%c0_59, %c0_60], %191 {strides = array<i32>} : memref<8x128xf32, #tpu.memory_space<vmem>>, vector<8x128xf32>,
    return
  }
  func.func @transform_0(%arg0: i32) -> (i32, i32) {
    %c0_i32 = arith.constant 0 : i32
    %c0_i32_0 = arith.constant 0 : i32
    %c0_i32_1 = arith.constant 0 : i32
    return %c0_i32, %c0_i32_0 : i32, i32
  }
  func.func @transform_1(%arg0: i32) -> (i32, i32) {
    %c0_i32 = arith.constant 0 : i32
    %c0_i32_0 = arith.constant 0 : i32
    %c0_i32_1 = arith.constant 0 : i32
    return %c0_i32, %c0_i32_0 : i32, i32
  }
  func.func @transform_2(%arg0: i32) -> (i32, i32) {
    %c0_i32 = arith.constant 0 : i32
    %c0_i32_0 = arith.constant 0 : i32
    %c0_i32_1 = arith.constant 0 : i32
    return %c0_i32, %c0_i32_0 : i32, i32
  }
}

</mosaic_0001>

<bundles_post_ra>
// kernel: ppo_forward.1
= control target key start
LH: loop header
LB: loop body
LE: loop exit
PB: predicated region body
PF: predicated region fallthrough
CT: control target
= control target key end

     0   :  { %vm118_vm0 = vcmask 64512   ;;  %v3135_v6 = vmov 0.0   ;;  %vm3136_vm1 = vmmov 0   ;;  %v3137_v7 = vmov 2   ;;  %s3141_s23 = smov 24   ;;  %s3142_s24 = smov 120   ;;  %s3784_s1 = inlined_call_operand.vmem [shape: f32[272,128], index: 1, kind: input, shape index: {}]   ;;  %s3785_s0 = inlined_call_operand.vmem [shape: f32[32,128], index: 0, kind: input, shape index: {}]   ;;  %s3786_s2 = inlined_call_operand.vmem [shape: f32[8,128], index: 2, kind: output, shape index: {}]  }
   0x1   :  { %v83_v0 = vld [vmem:[%s3784_s1] sm:$0xff]  ;;  %v3174_v2 = vld [vmem:[%s3785_s0 + $0x8] sm:$0xff]  ;;  %v3181_v3 = vld [vmem:[%s3785_s0 + $0x10] sm:$0xff]  ;;  %3072 = vset.pattern.permute.xlu1 %v3137_v7  ;;  %v3138_v8 = vmov 1   ;;  %v3139_v16 = vmov 3   ;;  %v3140_v21 = vmov 0   ;;  %v387_v22 = vlaneseq }
   0x2   :  { %v3169_v1 = vld [vmem:[%s3785_s0] sm:$0xff]  ;;  %2771 = vmatprep.subr.mxu0 %v83_v0  ;;  %v3190_v4 = vld [vmem:[%s3785_s0 + $0x18] sm:$0xff]  ;;  %v88_v5 = vld [vmem:[%s3784_s1 + $0x28] sm:$0xf]  ;;  %3071 = vset.pattern.permute.xlu0 %v3138_v8  ;;  %s3143_s25 = smov 56   ;;  %s3144_s26 = smov 88  }
   0x3   :  { %2773 = vmatprep.mubr.msk.f32.mxu0 %vm118_vm0, %v3169_v1  ;;  %2772 = vmatpush3.msra.mxu0 %v83_v0  ;;  %v89_v13 = vld [vmem:[%s3784_s1 + $0x30] sm:$0xf]  ;;  %v3257_v23 = vshrl.u32 %v387_v22, 7  ;;  %s3145_s27 = smov 32   ;;  %s3146_s28 = smov 64   ;;  %v3292_v55 = vld [vmem:[%s3784_s1 + $0x100] sm:$0xff] }
   0x4   :  { %2774 = vmatmul.mubr.msk.f32.vlgmr.msra.gmra.mxu0 %vm118_vm0, %v3174_v2  ;;  %2779 = vmatprep.subr.mxu1 %v88_v5  ;;  %s3147_s29 = smov 96   ;;  %v3297_v56 = vld [vmem:[%s3784_s1 + $0xf8] sm:$0xff]  ;;  %v3304_v58 = vld [vmem:[%s3784_s1 + $0xf0] sm:$0xff]  ;;  %v3311_v59 = vld [vmem:[%s3784_s1 + $0xe8] sm:$0xff]  ;;  %vm68_vm2 = vcmask 261120   ;;  %vm73_vm3 = vcmask 523264  }
   0x5   :  { %2776 = vmatprep.mubr.msk.f32.mxu0 %vm118_vm0, %v3181_v3  ;;  %2780 = vmatpush3.xpose.msra.mxu1 %v88_v5  ;;  %v413_v24 = vsub.s32 1, %v3257_v23  ;;  %v437_v26 = vsub.s32 2, %v3257_v23  ;;  %v461_v30 = vsub.s32 3, %v3257_v23  ;;  %vm78_vm4 = vcmask 785408  }
   0x6   :  { %2787 = vmatprep.subr.mxu0 %v3135_v6  ;;  %2798 = vmatprep.subr.mxu1 %v3292_v55  ;;  %vm2366_vm13 = vcmask 7168  }
   0x8   :  { %2777 = vmatmul.mubr.msk.f32.gmra.mxu0 %vm118_vm0, %v3190_v4 }
   0x9   :  { %2795 = vmatprep.mubr.msk.f32.mxu0 %vm3136_vm1, %v3135_v6 }
  0xc4   :  { %v3202_v9 = vpop.f32.mrf.mxu0 }
  0xc6   :  { %v3204_v10 = vpop.f32.mrf.mxu0 }
  0xc7   :  { %2781 = vmatprep.mubr.f32.mxu1 %v3204_v10 }
  0xc8   :  { %v3207_v11 = vpop.f32.mrf.mxu0  ;;  %2782 = vmatmul.mubr.f32.vlgmr.msra.gmra.mxu1 %v3202_v9 }
  0xc9   :  { %2788 = vmatpush3.xpose.msra.mxu0 %v3207_v11  ;;  %2799 = vmatpush3.msra.mxu1 %v3292_v55 }
  0xca   :  { %v3211_v12 = vpop.f32.mrf.mxu0  ;;  %2789 = vmatprep.subr.mxu0 %v3135_v6  ;;  %2800 = vmatprep.subr.mxu1 %v3297_v56 }
  0xcb   :  { %2784 = vmatprep.mubr.f32.mxu1 %v3211_v12  ;;  %2801 = vmatpush3.msra.mxu1 %v3297_v56 }
  0xcc   :  { %2785 = vmatmul.mubr.f32.gmra.mxu1 %v3207_v11  ;;  %2802 = vmatprep.subr.mxu1 %v3304_v58 }
  0xcd   :  { %2790 = vmatpush3.xpose.msra.mxu0 %v3211_v12  ;;  %2803 = vmatpush3.msra.mxu1 %v3304_v58 }
  0xce   :  { %2791 = vmatprep.subr.mxu0 %v3135_v6  ;;  %2804 = vmatprep.subr.mxu1 %v3311_v59 }
  0xcf   :  { %2805 = vmatpush3.msra.mxu1 %v3311_v59 }
  0xd1   :  { %2792 = vmatpush3.xpose.msra.mxu0 %v3202_v9 }
  0xd2   :  { %2793 = vmatprep.subr.mxu0 %v3135_v6 }
  0xd5   :  { %2794 = vmatpush3.xpose.msra.mxu0 %v3204_v10 }
  0xd8   :  { %2796 = vmatmul.mubr.f32.vlgmr.msra.gmra.mxu0 %v89_v13 }
 0x188   :  { %v2783_v14 = vpop.f32.mrf.mxu1 }
 0x189   :  { %424 = vperm.xlu1 %3072, %v2783_v14   ;;  %400 = vperm.xlu0 %3071, %v2783_v14  }
 0x18a   :  { %v278_v15 = vpop.f32.mrf.mxu1 }
 0x18c   :  { %v2786_v17 = vpop.f32.mrf.mxu1 }
 0x18d   :  { %3073 = vset.pattern.permute.xlu1 %v3139_v16  ;;  %396 = vperm.xlu0 %3071, %v278_v15  }
 0x18e   :  { %448 = vperm.xlu1 %3073, %v2783_v14   ;;  %v288_v20 = vpop.f32.mrf.mxu1 }
 0x191   :  { %3075 = vset.pattern.permute.xlu0 %v3139_v16 }
 0x192   :  { %3074 = vset.pattern.permute.xlu1 %v3137_v7  ;;  %444 = vperm.xlu0 %3075, %v278_v15  }
 0x193   :  { %420 = vperm.xlu1 %3074, %v278_v15  }
 0x196   :  { %3076 = vset.pattern.permute.xlu0 %v3138_v8 }
 0x197   :  { %432 = vperm.xlu1 %3074, %v2786_v17   ;;  %408 = vperm.xlu0 %3076, %v2786_v17  }
 0x198   :  { %v3228_v18 = vpop.f32.mrf.mxu0 }
 0x199   :  { %v414_v25 = vrot.slane %v3228_v18, %v413_v24  ;;  %v438_v29 = vrot.slane %v3228_v18, %v437_v26  ;;  %v462_v33 = vrot.slane %v3228_v18, %v461_v30 }
 0x19a   :  { %v2797_v19 = vpop.f32.mrf.mxu0 }
 0x19b   :  { %3077 = vset.pattern.permute.xlu1 %v3138_v8  ;;  %3081 = vset.pattern.permute.xlu0 %v3139_v16  ;;  %v389_v19 = vsub.s32 0, %v3257_v23 }
 0x19c   :  { %452 = vperm.xlu0 %3081, %v288_v20   ;;  %404 = vperm.xlu1 %3077, %v288_v20  }
 0x1a0   :  { %3082 = vset.pattern.permute.xlu0 %v3140_v21  ;;  %3078 = vset.pattern.permute.xlu1 %v3137_v7 }
 0x1a1   :  { %374 = vperm.xlu0 %3082, %v2783_v14   ;;  %428 = vperm.xlu1 %3078, %v288_v20  }
 0x1a5   :  { %3079 = vset.pattern.permute.xlu1 %v3139_v16  ;;  %32 = vrot.lane.b32.xlu0 %v3169_v1, %s3141_s23 }
 0x1a6   :  { %456 = vperm.xlu1 %3079, %v2786_v17   ;;  %3084 = vset.pattern.permute.xlu0 %v3137_v7 }
 0x1a9   :  { %22 = vrot.lane.b32.xlu0 %v3174_v2, %s3142_s24 }
 0x1aa   :  { %3080 = vset.pattern.permute.xlu1 %v3140_v21 }
 0x1ab   :  { %369 = vperm.xlu1 %3080, %v278_v15  }
 0x1ad   :  { %44 = vrot.lane.b32.xlu0 %v3169_v1, %s3143_s25 }
 0x1af   :  { %384 = vperm.xlu1 %3080, %v2786_v17  }
 0x1b1   :  { %46 = vrot.lane.b32.xlu0 %v3174_v2, %s3143_s25 }
 0x1b3   :  { %20 = vrot.lane.b32.xlu1 %v3169_v1, %s3142_s24 }
 0x1b5   :  { %58 = vrot.lane.b32.xlu0 %v3174_v2, %s3144_s26 }
 0x1b7   :  { %34 = vrot.lane.b32.xlu1 %v3174_v2, %s3141_s23 }
 0x1b9   :  { %36 = vrot.lane.b32.xlu0 %v3181_v3, %s3141_s23 }
 0x1bb   :  { %56 = vrot.lane.b32.xlu1 %v3169_v1, %s3144_s26 }
 0x1bd   :  { %26 = vrot.lane.b32.xlu0 %v3190_v4, %s3142_s24 }
 0x1bf   :  { %24 = vrot.lane.b32.xlu1 %v3181_v3, %s3142_s24 }
 0x1c1   :  { %48 = vrot.lane.b32.xlu0 %v3181_v3, %s3143_s25 }
 0x1c3   :  { %38 = vrot.lane.b32.xlu1 %v3190_v4, %s3141_s23 }
 0x1c7   :  { %379 = vperm.xlu1 %3080, %v288_v20  }
 0x1cb   :  { %3083 = vset.pattern.permute.xlu1 %v3138_v8 }
 0x204   :  { %v425_v27 = vpop.permute.xlu1 %424  ;;  %v401_v28 = vpop.permute.xlu0 %400 }
 0x205   :  { %v416_v31 = vadd.f32 %v414_v25, %v401_v28  ;;  %v440_v34 = vadd.f32 %v438_v29, %v425_v27  ;;  %v390_v27 = vrot.slane %v3228_v18, %v389_v19 }
 0x207   :  { %473 = vrot.lane.b32.xlu1 %v416_v31, %s3145_s27 }
 0x208   :  { %v397_v32 = vpop.permute.xlu0 %396 }
 0x209   :  { %v415_v35 = vadd.f32 %v414_v25, %v397_v32  ;;  %v449_v36 = vpop.permute.xlu1 %448 }
 0x20a   :  { %v464_v37 = vadd.f32 %v462_v33, %v449_v36 }
 0x20b   :  { %471 = vrot.lane.b32.xlu0 %v415_v35, %s3145_s27  ;;  %489 = vrot.lane.b32.xlu1 %v440_v34, %s3146_s28 }
 0x20d   :  { %v445_v38 = vpop.permute.xlu0 %444 }
 0x20e   :  { %v421_v39 = vpop.permute.xlu1 %420  ;;  %v463_v43 = vadd.f32 %v462_v33, %v445_v38 }
 0x20f   :  { %v439_v40 = vadd.f32 %v438_v29, %v421_v39  ;;  %505 = vrot.lane.b32.xlu1 %v464_v37, %s3147_s29 }
 0x211   :  { %487 = vrot.lane.b32.xlu0 %v439_v40, %s3146_s28 }
 0x212   :  { %v433_v41 = vpop.permute.xlu1 %432  ;;  %v409_v42 = vpop.permute.xlu0 %408 }
 0x213   :  { %v442_v44 = vadd.f32 %v438_v29, %v433_v41  ;;  %v418_v45 = vadd.f32 %v414_v25, %v409_v42 }
 0x215   :  { %503 = vrot.lane.b32.xlu0 %v463_v43, %s3147_s29  ;;  %493 = vrot.lane.b32.xlu1 %v442_v44, %s3146_s28 }
 0x217   :  { %v405_v46 = vpop.permute.xlu1 %404  ;;  %v453_v47 = vpop.permute.xlu0 %452 }
 0x218   :  { %v465_v48 = vadd.f32 %v462_v33, %v453_v47  ;;  %v417_v52 = vadd.f32 %v414_v25, %v405_v46 }
 0x219   :  { %477 = vrot.lane.b32.xlu0 %v418_v45, %s3145_s27 }
 0x21c   :  { %v429_v49 = vpop.permute.xlu1 %428  ;;  %v375_v57 = vpop.permute.xlu0 %374 }
 0x21d   :  { %507 = vrot.lane.b32.xlu0 %v465_v48, %s3147_s29  ;;  %v441_v53 = vadd.f32 %v438_v29, %v429_v49  ;;  %v392_v29 = vadd.f32 %v390_v27, %v375_v57 }
 0x220   :  { %v33_v61 = vpop.permute.xlu0 %32 }
 0x221   :  { %60 = vrot.lane.b32.xlu0 %v3181_v3, %s3144_s26  ;;  %v457_v50 = vpop.permute.xlu1 %456 }
 0x222   :  { %v466_v51 = vadd.f32 %v462_v33, %v457_v50 }
 0x224   :  { %509 = vrot.lane.b32.xlu1 %v466_v51, %s3147_s29  ;;  %v23_v63 = vpop.permute.xlu0 %22 }
 0x226   :  { %v370_v54 = vpop.permute.xlu1 %369 }
 0x227   :  { %v391_v39 = vadd.f32 %v390_v27, %v370_v54  ;;  %v3360_v54 = vld [vmem:[%s3784_s1 + $0xe0] sm:$0xff] }
 0x228   :  { %475 = vrot.lane.b32.xlu1 %v417_v52, %s3145_s27  ;;  %v45_v1 = vpop.permute.xlu0 %44  ;;  %2806 = vmatprep.subr.mxu1 %v3360_v54 }
 0x229   :  { %2807 = vmatpush3.msra.mxu1 %v3360_v54 }
 0x22a   :  { %v3313_v60 = vpop.permute.xlu1 %384 }
 0x22c   :  { %491 = vrot.lane.b32.xlu1 %v441_v53, %s3146_s28  ;;  %v47_v3 = vpop.permute.xlu0 %46 }
 0x22e   :  { %v21_v62 = vpop.permute.xlu1 %20 }
 0x22f   :  { %v69_v40 = vsel %vm68_vm2, %v21_v62, %v33_v61  ;;  %v3367_v61 = vld [vmem:[%s3784_s1 + $0xd8] sm:$0xff] }
 0x230   :  { %50 = vrot.lane.b32.xlu1 %v3190_v4, %s3143_s25  ;;  %v59_v5 = vpop.permute.xlu0 %58  ;;  %v74_v47 = vsel %vm73_vm3, %v69_v40, %v45_v1  ;;  %2808 = vmatprep.subr.mxu1 %v3367_v61  ;;  %v394_v1 = vadd.f32 %v390_v27, %v3313_v60  ;;  %v3399_v60 = vld [vmem:[%s3784_s1 + $0xb8] sm:$0xff] }
 0x231   :  { %2809 = vmatpush3.msra.mxu1 %v3367_v61 }
 0x232   :  { %v35_v0 = vpop.permute.xlu1 %34 }
 0x233   :  { %v70_v31 = vsel %vm68_vm2, %v23_v63, %v35_v0  ;;  %v3374_v63 = vld [vmem:[%s3784_s1 + $0xd0] sm:$0xff]  ;;  %v3381_v0 = vld [vmem:[%s3784_s1 + $0xc8] sm:$0xff] }
 0x234   :  { %62 = vrot.lane.b32.xlu1 %v3190_v4, %s3144_s26  ;;  %v3323_v14 = vpop.permute.xlu0 %36  ;;  %v75_v36 = vsel %vm73_vm3, %v70_v31, %v47_v3  ;;  %2810 = vmatprep.subr.mxu1 %v3374_v63  ;;  %v3414_v31 = vld [vmem:[%s3784_s1 + $0xa8] sm:$0xff] }
 0x235   :  { %v3340_v41 = vsel %vm78_vm4, %v75_v36, %v59_v5  ;;  %2811 = vmatpush3.msra.mxu1 %v3374_v63  ;;  %v3391_v5 = vld [vmem:[%s3784_s1 + $0xc0] sm:$0xff] }
 0x236   :  { %v57_v2 = vpop.permute.xlu1 %56  ;;  %2812 = vmatprep.subr.mxu1 %v3381_v0 }
 0x237   :  { %v3351_v50 = vsel %vm78_vm4, %v74_v47, %v57_v2  ;;  %2813 = vmatpush3.msra.mxu1 %v3381_v0 }
 0x238   :  { %v3325_v17 = vpop.permute.xlu0 %26  ;;  %2814 = vmatprep.subr.mxu1 %v3391_v5 }
 0x239   :  { %2815 = vmatpush3.msra.mxu1 %v3391_v5 }
 0x23a   :  { %v3319_v4 = vpop.permute.xlu1 %24  ;;  %2816 = vmatprep.subr.mxu1 %v3399_v60 }
 0x23b   :  { %2817 = vmatpush3.msra.mxu1 %v3399_v60 }
 0x23c   :  { %v3328_v25 = vpop.permute.xlu0 %48 }
 0x23e   :  { %v3321_v13 = vpop.permute.xlu1 %38 }
 0x242   :  { %v380_v15 = vpop.permute.xlu1 %379 }
 0x279   :  { %v474_v20 = vpop.permute.xlu1 %473 }
 0x27a   :  { %v516_v33 = vsel %vm68_vm2, %v392_v29, %v474_v20  ;;  %v393_v20 = vadd.f32 %v390_v27, %v380_v15  ;;  %v3407_v29 = vld [vmem:[%s3784_s1 + $0xb0] sm:$0xff] }
 0x27b   :  { %2818 = vmatprep.subr.mxu1 %v3407_v29 }
 0x27c   :  { %2819 = vmatpush3.msra.mxu1 %v3407_v29 }
 0x27d   :  { %v490_v28 = vpop.permute.xlu1 %489  ;;  %v472_v32 = vpop.permute.xlu0 %471  ;;  %2820 = vmatprep.subr.mxu1 %v3414_v31 }
 0x27e   :  { %v520_v34 = vsel %vm73_vm3, %v516_v33, %v490_v28  ;;  %v515_v43 = vsel %vm68_vm2, %v391_v39, %v472_v32  ;;  %v71_v32 = vsel %vm68_vm2, %v3319_v4, %v3323_v14  ;;  %v3431_v4 = vld [vmem:[%s3784_s1 + $0xa0] sm:$0xff]  ;;  %2821 = vmatpush3.msra.mxu1 %v3414_v31  ;;  %v3439_v39 = vld [vmem:[%s3784_s1 + $0x98] sm:$0xff] }
 0x27f   :  { %v76_v14 = vsel %vm73_vm3, %v71_v32, %v3328_v25  ;;  %2822 = vmatprep.subr.mxu1 %v3431_v4  ;;  %v72_v25 = vsel %vm68_vm2, %v3325_v17, %v3321_v13  ;;  %v3463_v13 = vld [vmem:[%s3784_s1 + $0x88] sm:$0xff] }
 0x280   :  { %2823 = vmatpush3.msra.mxu1 %v3431_v4 }
 0x281   :  { %v506_v35 = vpop.permute.xlu1 %505  ;;  %2824 = vmatprep.subr.mxu1 %v3439_v39 }
 0x282   :  { %v524_v37 = vsel %vm78_vm4, %v520_v34, %v506_v35  ;;  %2825 = vmatpush3.msra.mxu1 %v3439_v39 }
 0x283   :  { %vm528_vm5 = vcmp.gt.f32.partialorder %v524_v37, 0.0  ;;  %v532_v38 = vmul.f32 0.2, %v524_v37  ;;  %v488_v18 = vpop.permute.xlu0 %487 }
 0x284   :  { %v519_v45 = vsel %vm73_vm3, %v515_v43, %v488_v18 }
 0x285   :  { %v536_v42 = vsel %vm528_vm5, %v524_v37, %v532_v38 }
 0x286   :  { %v3344_v44 = vadd.f32 %v536_v42, %v3340_v41 }
 0x287   :  { %v504_v46 = vpop.permute.xlu0 %503  ;;  %v494_v53 = vpop.permute.xlu1 %493 }
 0x288   :  { %v523_v48 = vsel %vm78_vm4, %v519_v45, %v504_v46  ;;  %545 = vmax.xlane.f32.xlu1 %v3344_v44  ;;  %v3456_v46 = vld [vmem:[%s3784_s1 + $0x90] sm:$0xff] }
 0x289   :  { %vm527_vm6 = vcmp.gt.f32.partialorder %v523_v48, 0.0  ;;  %v531_v49 = vmul.f32 0.2, %v523_v48  ;;  %2826 = vmatprep.subr.mxu1 %v3456_v46 }
 0x28a   :  { %2827 = vmatpush3.msra.mxu1 %v3456_v46 }
 0x28b   :  { %v535_v51 = vsel %vm527_vm6, %v523_v48, %v531_v49  ;;  %v478_v57 = vpop.permute.xlu0 %477  ;;  %2828 = vmatprep.subr.mxu1 %v3463_v13 }
 0x28c   :  { %v3354_v52 = vadd.f32 %v535_v51, %v3351_v50  ;;  %v518_v28 = vsel %vm68_vm2, %v394_v1, %v478_v57  ;;  %2829 = vmatpush3.msra.mxu1 %v3463_v13 }
 0x28d   :  { %v522_v33 = vsel %vm73_vm3, %v518_v28, %v494_v53 }
 0x28e   :  { %543 = vmax.xlane.f32.xlu0 %v3354_v52 }
 0x28f   :  { %v508_v2 = vpop.permute.xlu0 %507 }
 0x293   :  { %v61_v35 = vpop.permute.xlu0 %60 }
 0x294   :  { %v3442_v40 = vsel %vm78_vm4, %v76_v14, %v61_v35 }
 0x296   :  { %v510_v62 = vpop.permute.xlu1 %509 }
 0x297   :  { %v526_v36 = vsel %vm78_vm4, %v522_v33, %v510_v62 }
 0x298   :  { %v534_v42 = vmul.f32 0.2, %v526_v36  ;;  %vm530_vm8 = vcmp.gt.f32.partialorder %v526_v36, 0.0 }
 0x299   :  { %682 = vrot.lane.b32.xlu1 %v3207_v11, %s3147_s29 }
 0x29a   :  { %v476_v3 = vpop.permute.xlu1 %475  ;;  %v538_v49 = vsel %vm530_vm8, %v526_v36, %v534_v42 }
 0x29b   :  { %v517_v15 = vsel %vm68_vm2, %v393_v20, %v476_v3 }
 0x29d   :  { %678 = vrot.lane.b32.xlu1 %v3202_v9, %s3147_s29 }
 0x29e   :  { %v492_v27 = vpop.permute.xlu1 %491 }
 0x29f   :  { %v521_v34 = vsel %vm73_vm3, %v517_v15, %v492_v27 }
 0x2a0   :  { %v525_v37 = vsel %vm78_vm4, %v521_v34, %v508_v2 }
 0x2a1   :  { %v533_v38 = vmul.f32 0.2, %v525_v37  ;;  %676 = vrot.lane.b32.xlu1 %v3204_v10, %s3147_s29  ;;  %vm529_vm7 = vcmp.gt.f32.partialorder %v525_v37, 0.0 }
 0x2a2   :  { %v51_v18 = vpop.permute.xlu1 %50 }
 0x2a3   :  { %v537_v43 = vsel %vm529_vm7, %v525_v37, %v533_v38  ;;  %v77_v47 = vsel %vm73_vm3, %v72_v25, %v51_v18 }
 0x2a4   :  { %v541_v45 = vadd.f32 %v537_v43, %v3442_v40 }
 0x2a5   :  { %886 = vrot.lane.b32.xlu1 %v3211_v12, %s3146_s28 }
 0x2a6   :  { %547 = vmax.xlane.f32.xlu0 %v541_v45  ;;  %v63_v48 = vpop.permute.xlu1 %62 }
 0x2a7   :  { %v3466_v17 = vsel %vm78_vm4, %v77_v47, %v63_v48 }
 0x2a8   :  { %v542_v51 = vadd.f32 %v538_v49, %v3466_v17 }
 0x2a9   :  { %884 = vrot.lane.b32.xlu1 %v3202_v9, %s3146_s28 }
 0x2aa   :  { %549 = vmax.xlane.f32.xlu0 %v542_v51 }
 0x2ad   :  { %882 = vrot.lane.b32.xlu1 %v3204_v10, %s3146_s28 }
 0x2c0   :  { %680 = vrot.lane.b32.xlu0 %v3211_v12, %s3147_s29 }
 0x2c4   :  { %888 = vrot.lane.b32.xlu0 %v3207_v11, %s3146_s28 }
 0x2c8   :  { %1005 = vrot.lane.b32.xlu0 %v3207_v11, %s3145_s27 }
 0x2cc   :  { %1003 = vrot.lane.b32.xlu0 %v3211_v12, %s3145_s27 }
 0x311   :  { %v546_v53 = vpop.xlane.xlu1 %545 }
 0x312   :  { %v552_v57 = vsub.f32 %v3344_v44, %v546_v53 }
 0x314   :  { %v557_v3 = vmul.f32 1.442695, %v552_v57 }
 0x315   :  { %v683_v62 = vpop.permute.xlu1 %682 }
 0x316   :  { %2836 = vmatprep.subr.mxu0 %v683_v62 }
 0x317   :  { %v544_v1 = vpop.xlane.xlu0 %543  ;;  %2837 = vmatpush3.msra.mxu0 %v683_v62 }
 0x318   :  { %v551_v2 = vsub.f32 %v3354_v52, %v544_v1 }
 0x319   :  { %v679_v35 = vpop.permute.xlu1 %678 }
 0x31a   :  { %v555_v20 = vmul.f32 1.442695, %v551_v2 }
 0x31c   :  { %3097 = vpow2.f32 %v555_v20 }
 0x31d   :  { %3099 = vpow2.f32 %v557_v3  ;;  %v677_v52 = vpop.permute.xlu1 %676 }
 0x329   :  { %v3098_v28 = vpop.eup %3097 }
 0x32a   :  { %v3100_v15 = vpop.eup %3099  ;;  %2830 = vmatprep.mubr.f32.mxu1 %v3098_v28 }
 0x32b   :  { %2831 = vmatmul.mubr.f32.vlgmr.msra.gmra.mxu1 %v3100_v15 }
 0x32f   :  { %v548_v27 = vpop.xlane.xlu0 %547 }
 0x330   :  { %v553_v32 = vsub.f32 %v541_v45, %v548_v27 }
 0x332   :  { %v559_v33 = vmul.f32 1.442695, %v553_v32 }
 0x333   :  { %v550_v34 = vpop.xlane.xlu0 %549 }
 0x334   :  { %3101 = vpow2.f32 %v559_v33  ;;  %v554_v44 = vsub.f32 %v542_v51, %v550_v34 }
 0x336   :  { %v561_v36 = vmul.f32 1.442695, %v554_v44 }
 0x337   :  { %v681_v37 = vpop.permute.xlu0 %680 }
 0x338   :  { %3103 = vpow2.f32 %v561_v36  ;;  %2838 = vmatprep.subr.mxu0 %v681_v37 }
 0x339   :  { %2839 = vmatpush3.msra.mxu0 %v681_v37 }
 0x33a   :  { %2840 = vmatprep.subr.mxu0 %v679_v35 }
 0x33b   :  { %v3487_v38 = vpop.permute.xlu0 %888  ;;  %2841 = vmatpush3.msra.mxu0 %v679_v35 }
 0x33c   :  { %2842 = vmatprep.subr.mxu0 %v677_v52 }
 0x33d   :  { %2843 = vmatpush3.msra.mxu0 %v677_v52 }
 0x33e   :  { %2850 = vmatprep.subr.mxu0 %v3207_v11 }
 0x33f   :  { %v1006_v14 = vpop.permute.xlu0 %1005 }
 0x340   :  { %2878 = vmatprep.subr.mxu1 %v1006_v14 }
 0x341   :  { %v3102_v18 = vpop.eup %3101  ;;  %2879 = vmatpush3.msra.mxu1 %v1006_v14 }
 0x342   :  { %2833 = vmatprep.mubr.f32.mxu1 %v3102_v18 }
 0x343   :  { %v1004_v42 = vpop.permute.xlu0 %1003 }
 0x344   :  { %2880 = vmatprep.subr.mxu1 %v1004_v42 }
 0x345   :  { %v3104_v43 = vpop.eup %3103  ;;  %2881 = vmatpush3.msra.mxu1 %v1004_v42 }
 0x346   :  { %2834 = vmatmul.mubr.f32.gmra.mxu1 %v3104_v43 }
 0x3eb   :  { %v2832_v45 = vpop.f32.mrf.mxu1 }
 0x3ec   :  { %v649_v25 = vmax.f32 %v2832_v45, 1e-30  ;;  %v87_v45 = vld [vmem:[%s3784_s1 + $0x20] sm:$0xff] }
 0x3ed   :  { %v629_v47 = vpop.f32.mrf.mxu1 }
 0x3ee   :  { %3105 = vrcp.f32 %v649_v25  ;;  %v648_v48 = vmax.f32 %v629_v47, 1e-30  ;;  %v86_v25 = vld [vmem:[%s3784_s1 + $0x18] sm:$0xff]  ;;  %v85_v47 = vld [vmem:[%s3784_s1 + $0x10] sm:$0xff] }
 0x3f0   :  { %3107 = vrcp.f32 %v648_v48  ;;  %v84_v48 = vld [vmem:[%s3784_s1 + $0x8] sm:$0xff] }
 0x3fb   :  { %v3106_v49 = vpop.eup %3105 }
 0x3fc   :  { %v655_v51 = vmul.f32 %v3106_v49, %v3100_v15  ;;  %v90_v49 = vld [vmem:[%s3784_s1 + $0x38] sm:$0xf] }
 0x3fd   :  { %v3108_v53 = vpop.eup %3107 }
 0x3fe   :  { %666 = vrot.lane.b32.xlu1 %v655_v51, %s3147_s29  ;;  %v653_v57 = vmul.f32 %v3108_v53, %v3098_v28  ;;  %v887_v28 = vpop.permute.xlu1 %886 }
 0x400   :  { %664 = vrot.lane.b32.xlu0 %v653_v57, %s3147_s29 }
 0x402   :  { %v885_v15 = vpop.permute.xlu1 %884 }
 0x406   :  { %v2835_v62 = vpop.f32.mrf.mxu1  ;;  %v883_v34 = vpop.permute.xlu1 %882 }
 0x407   :  { %v651_v1 = vmax.f32 %v2835_v62, 1e-30 }
 0x408   :  { %v639_v2 = vpop.f32.mrf.mxu1 }
 0x409   :  { %3109 = vrcp.f32 %v651_v1  ;;  %v650_v3 = vmax.f32 %v639_v2, 1e-30 }
 0x40b   :  { %3111 = vrcp.f32 %v650_v3 }
 0x416   :  { %v3110_v20 = vpop.eup %3109 }
 0x417   :  { %v659_v27 = vmul.f32 %v3110_v20, %v3104_v43 }
 0x418   :  { %v3112_v32 = vpop.eup %3111 }
 0x419   :  { %670 = vrot.lane.b32.xlu1 %v659_v27, %s3147_s29  ;;  %v657_v33 = vmul.f32 %v3112_v32, %v3102_v18 }
 0x41b   :  { %668 = vrot.lane.b32.xlu0 %v657_v33, %s3147_s29 }
 0x41d   :  { %874 = vrot.lane.b32.xlu1 %v653_v57, %s3146_s28 }
 0x41f   :  { %1001 = vrot.lane.b32.xlu0 %v3202_v9, %s3145_s27 }
 0x421   :  { %999 = vrot.lane.b32.xlu1 %v3204_v10, %s3145_s27 }
 0x423   :  { %876 = vrot.lane.b32.xlu0 %v655_v51, %s3146_s28 }
 0x425   :  { %993 = vrot.lane.b32.xlu1 %v655_v51, %s3145_s27 }
 0x427   :  { %991 = vrot.lane.b32.xlu0 %v653_v57, %s3145_s27 }
 0x429   :  { %880 = vrot.lane.b32.xlu1 %v659_v27, %s3146_s28 }
 0x42b   :  { %878 = vrot.lane.b32.xlu0 %v657_v33, %s3146_s28 }
 0x42d   :  { %997 = vrot.lane.b32.xlu1 %v659_v27, %s3145_s27 }
 0x42f   :  { %995 = vrot.lane.b32.xlu0 %v657_v33, %s3145_s27 }
 0x470   :  { %v667_v35 = vpop.permute.xlu1 %666 }
 0x472   :  { %v665_v44 = vpop.permute.xlu0 %664 }
 0x473   :  { %2844 = vmatprep.mubr.msk.f32.mxu0 %vm68_vm2, %v665_v44 }
 0x474   :  { %2845 = vmatmul.mubr.msk.f32.vlgmr.msra.gmra.mxu0 %vm68_vm2, %v667_v35 }
 0x475   :  { %2851 = vmatpush3.msra.mxu0 %v3207_v11 }
 0x476   :  { %2852 = vmatprep.subr.mxu0 %v3211_v12 }
 0x477   :  { %2853 = vmatpush3.msra.mxu0 %v3211_v12 }
 0x478   :  { %2854 = vmatprep.subr.mxu0 %v3202_v9 }
 0x479   :  { %2855 = vmatpush3.msra.mxu0 %v3202_v9 }
 0x47a   :  { %2856 = vmatprep.subr.mxu0 %v3204_v10 }
 0x47b   :  { %2857 = vmatpush3.msra.mxu0 %v3204_v10 }
 0x47c   :  { %2864 = vmatprep.subr.mxu0 %v3487_v38 }
 0x48b   :  { %v671_v36 = vpop.permute.xlu1 %670 }
 0x48d   :  { %v669_v37 = vpop.permute.xlu0 %668 }
 0x48e   :  { %2847 = vmatprep.mubr.msk.f32.mxu0 %vm68_vm2, %v669_v37 }
 0x48f   :  { %2848 = vmatmul.mubr.msk.f32.gmra.mxu0 %vm68_vm2, %v671_v36  ;;  %v875_v11 = vpop.permute.xlu1 %874 }
 0x490   :  { %2858 = vmatprep.mubr.msk.f32.mxu0 %vm68_vm2, %v653_v57 }
 0x491   :  { %v1002_v12 = vpop.permute.xlu0 %1001 }
 0x492   :  { %2882 = vmatprep.subr.mxu1 %v1002_v12 }
 0x493   :  { %2859 = vmatmul.mubr.msk.f32.vlgmr.msra.gmra.mxu0 %vm68_vm2, %v655_v51  ;;  %2883 = vmatpush3.msra.mxu1 %v1002_v12  ;;  %v1000_v9 = vpop.permute.xlu1 %999  ;;  %v2588_v12 = vld [vmem:[%s3784_s1 + $0x48] ss:$0 sm:$0xff] }
 0x494   :  { %2865 = vmatpush3.msra.mxu0 %v3487_v38  ;;  %2861 = vmatprep.mubr.msk.f32.mxu0 %vm68_vm2, %v657_v33 }
 0x495   :  { %2866 = vmatprep.subr.mxu0 %v887_v28  ;;  %2884 = vmatprep.subr.mxu1 %v1000_v9  ;;  %v877_v10 = vpop.permute.xlu0 %876 }
 0x496   :  { %2867 = vmatpush3.msra.mxu0 %v887_v28  ;;  %2885 = vmatpush3.msra.mxu1 %v1000_v9 }
 0x497   :  { %2868 = vmatprep.subr.mxu0 %v885_v15  ;;  %2862 = vmatmul.mubr.msk.f32.gmra.mxu0 %vm68_vm2, %v659_v27  ;;  %v994_v52 = vpop.permute.xlu1 %993 }
 0x498   :  { %2869 = vmatpush3.msra.mxu0 %v885_v15  ;;  %2872 = vmatprep.mubr.msk.f32.mxu0 %vm68_vm2, %v875_v11 }
 0x499   :  { %2870 = vmatprep.subr.mxu0 %v883_v34  ;;  %v992_v14 = vpop.permute.xlu0 %991  ;;  %2906 = vmatprep.subr.mxu1 %v90_v49 }
 0x49a   :  { %2871 = vmatpush3.msra.mxu0 %v883_v34  ;;  %2886 = vmatprep.mubr.msk.f32.mxu1 %vm68_vm2, %v992_v14 }
 0x49b   :  { %2873 = vmatmul.mubr.msk.f32.vlgmr.msra.gmra.mxu0 %vm68_vm2, %v877_v10  ;;  %2887 = vmatmul.mubr.msk.f32.vlgmr.msra.gmra.mxu1 %vm68_vm2, %v994_v52  ;;  %v881_v38 = vpop.permute.xlu1 %880 }
 0x49c   :  { %2892 = vmatprep.subr.mxu0 %v87_v45  ;;  %2907 = vmatpush3.xpose.msra.mxu1 %v90_v49 }
 0x49d   :  { %v879_v18 = vpop.permute.xlu0 %878  ;;  %2893 = vmatpush3.msra.mxu0 %v87_v45  ;;  %2925 = vmatprep.subr.mxu1 %v3292_v55 }
 0x49e   :  { %2875 = vmatprep.mubr.msk.f32.mxu0 %vm68_vm2, %v879_v18  ;;  %2894 = vmatprep.subr.mxu0 %v86_v25 }
 0x49f   :  { %2876 = vmatmul.mubr.msk.f32.gmra.mxu0 %vm68_vm2, %v881_v38  ;;  %v998_v43 = vpop.permute.xlu1 %997 }
 0x4a0   :  { %2895 = vmatpush3.msra.mxu0 %v86_v25 }
 0x4a1   :  { %v996_v42 = vpop.permute.xlu0 %995  ;;  %2896 = vmatprep.subr.mxu0 %v85_v47 }
 0x4a2   :  { %2889 = vmatprep.mubr.msk.f32.mxu1 %vm68_vm2, %v996_v42  ;;  %2897 = vmatpush3.msra.mxu0 %v85_v47 }
 0x4a3   :  { %2890 = vmatmul.mubr.msk.f32.gmra.mxu1 %vm68_vm2, %v998_v43  ;;  %2898 = vmatprep.subr.mxu0 %v84_v48 }
 0x4a4   :  { %2899 = vmatpush3.msra.mxu0 %v84_v48 }
 0x4a5   :  { %2914 = vmatprep.subr.mxu0 %v3135_v6 }
 0x534   :  { %v2846_v51 = vpop.f32.mrf.mxu0 }
 0x536   :  { %v762_v53 = vpop.f32.mrf.mxu0 }
 0x54f   :  { %v2849_v57 = vpop.f32.mrf.mxu0 }
 0x551   :  { %v772_v62 = vpop.f32.mrf.mxu0 }
 0x553   :  { %v2860_v1 = vpop.f32.mrf.mxu0 }
 0x554   :  { %v861_v27 = vadd.f32 %v2860_v1, %v2846_v51 }
 0x555   :  { %v855_v2 = vpop.f32.mrf.mxu0 }
 0x556   :  { %v856_v28 = vadd.f32 %v855_v2, %v762_v53 }
 0x557   :  { %v2863_v3 = vpop.f32.mrf.mxu0 }
 0x558   :  { %v871_v11 = vadd.f32 %v2863_v3, %v2849_v57 }
 0x559   :  { %v865_v20 = vpop.f32.mrf.mxu0 }
 0x55a   :  { %v866_v14 = vadd.f32 %v865_v20, %v772_v62 }
 0x55b   :  { %v2874_v32 = vpop.f32.mrf.mxu0  ;;  %v2888_v33 = vpop.f32.mrf.mxu1 }
 0x55c   :  { %v988_v15 = vadd.f32 %v2874_v32, %v861_v27 }
 0x55d   :  { %v968_v34 = vpop.f32.mrf.mxu0  ;;  %v1085_v36 = vpop.f32.mrf.mxu1 }
 0x55e   :  { %v1105_v44 = vadd.f32 %v2888_v33, %v988_v15  ;;  %v987_v35 = vadd.f32 %v968_v34, %v856_v28 }
 0x55f   :  { %v2877_v37 = vpop.f32.mrf.mxu0 }
 0x560   :  { %v1109_v9 = vmul.f32 0.25, %v1105_v44  ;;  %v1104_v10 = vadd.f32 %v1085_v36, %v987_v35  ;;  %v990_v18 = vadd.f32 %v2877_v37, %v871_v11 }
 0x561   :  { %v978_v52 = vpop.f32.mrf.mxu0 }
 0x562   :  { %v1108_v38 = vmul.f32 0.25, %v1104_v10  ;;  %v1117_v42 = vadd.f32 %v2588_v12, %v1109_v9  ;;  %v989_v25 = vadd.f32 %v978_v52, %v866_v14 }
 0x563   :  { %v2891_v43 = vpop.f32.mrf.mxu1 }
 0x564   :  { %v1116_v45 = vadd.f32 %v2588_v12, %v1108_v38  ;;  %v1107_v47 = vadd.f32 %v2891_v43, %v990_v18  ;;  %v1121_v57 = vmax.f32 %v1117_v42, 0.0 }
 0x565   :  { %v1095_v48 = vpop.f32.mrf.mxu1 }
 0x566   :  { %v1120_v49 = vmax.f32 %v1116_v45, 0.0  ;;  %v1111_v51 = vmul.f32 0.25, %v1107_v47  ;;  %v1106_v53 = vadd.f32 %v1095_v48, %v989_v25 }
 0x568   :  { %v1110_v1 = vmul.f32 0.25, %v1106_v53  ;;  %2900 = vmatprep.mubr.msk.f32.mxu0 %vm68_vm2, %v1120_v49  ;;  %v1119_v2 = vadd.f32 %v2588_v12, %v1111_v51 }
 0x569   :  { %2901 = vmatmul.mubr.msk.f32.vlgmr.msra.gmra.mxu0 %vm68_vm2, %v1121_v57 }
 0x56a   :  { %v1118_v3 = vadd.f32 %v2588_v12, %v1110_v1  ;;  %v1123_v20 = vmax.f32 %v1119_v2, 0.0 }
 0x56c   :  { %v1122_v62 = vmax.f32 %v1118_v3, 0.0 }
 0x56e   :  { %2903 = vmatprep.mubr.msk.f32.mxu0 %vm68_vm2, %v1122_v62 }
 0x56f   :  { %2904 = vmatmul.mubr.msk.f32.gmra.mxu0 %vm68_vm2, %v1123_v20 }
 0x570   :  { %2922 = vmatprep.mubr.msk.f32.mxu0 %vm3136_vm1, %v3135_v6 }
 0x629   :  { %v3557_v27 = vpop.f32.mrf.mxu0 }
 0x62b   :  { %v3559_v32 = vpop.f32.mrf.mxu0 }
 0x62c   :  { %2908 = vmatprep.mubr.f32.mxu1 %v3559_v32 }
 0x62d   :  { %2909 = vmatmul.mubr.f32.vlgmr.msra.gmra.mxu1 %v3557_v27 }
 0x62e   :  { %2926 = vmatpush3.msra.mxu1 %v3292_v55  ;;  %v91_v55 = vld [vmem:[%s3784_s1 + $0x40] sm:$0xf] }
 0x62f   :  { %v3564_v33 = vpop.f32.mrf.mxu0  ;;  %2927 = vmatprep.subr.mxu1 %v3297_v56 }
 0x630   :  { %2915 = vmatpush3.xpose.msra.mxu0 %v3564_v33  ;;  %2928 = vmatpush3.msra.mxu1 %v3297_v56 }
 0x631   :  { %v3569_v28 = vpop.f32.mrf.mxu0  ;;  %2916 = vmatprep.subr.mxu0 %v3135_v6  ;;  %2929 = vmatprep.subr.mxu1 %v3304_v58 }
 0x632   :  { %2911 = vmatprep.mubr.f32.mxu1 %v3569_v28  ;;  %2930 = vmatpush3.msra.mxu1 %v3304_v58 }
 0x633   :  { %2912 = vmatmul.mubr.f32.gmra.mxu1 %v3564_v33  ;;  %2931 = vmatprep.subr.mxu1 %v3311_v59 }
 0x634   :  { %2917 = vmatpush3.xpose.msra.mxu0 %v3569_v28  ;;  %2932 = vmatpush3.msra.mxu1 %v3311_v59 }
 0x635   :  { %2918 = vmatprep.subr.mxu0 %v3135_v6  ;;  %2933 = vmatprep.subr.mxu1 %v3360_v54 }
 0x636   :  { %2934 = vmatpush3.msra.mxu1 %v3360_v54 }
 0x637   :  { %2935 = vmatprep.subr.mxu1 %v3367_v61 }
 0x638   :  { %2919 = vmatpush3.xpose.msra.mxu0 %v3557_v27  ;;  %2936 = vmatpush3.msra.mxu1 %v3367_v61 }
 0x639   :  { %2920 = vmatprep.subr.mxu0 %v3135_v6  ;;  %2937 = vmatprep.subr.mxu1 %v3374_v63 }
 0x63a   :  { %2938 = vmatpush3.msra.mxu1 %v3374_v63 }
 0x63b   :  { %2939 = vmatprep.subr.mxu1 %v3381_v0 }
 0x63c   :  { %2921 = vmatpush3.xpose.msra.mxu0 %v3559_v32  ;;  %2940 = vmatpush3.msra.mxu1 %v3381_v0 }
 0x63d   :  { %2941 = vmatprep.subr.mxu1 %v3391_v5 }
 0x63e   :  { %2942 = vmatpush3.msra.mxu1 %v3391_v5 }
 0x63f   :  { %2923 = vmatmul.mubr.f32.vlgmr.msra.gmra.mxu0 %v91_v55  ;;  %2943 = vmatprep.subr.mxu1 %v3399_v60 }
 0x640   :  { %2944 = vmatpush3.msra.mxu1 %v3399_v60 }
 0x641   :  { %2945 = vmatprep.subr.mxu1 %v3407_v29 }
 0x642   :  { %2946 = vmatpush3.msra.mxu1 %v3407_v29 }
 0x643   :  { %2947 = vmatprep.subr.mxu1 %v3414_v31 }
 0x644   :  { %2948 = vmatpush3.msra.mxu1 %v3414_v31 }
 0x645   :  { %2949 = vmatprep.subr.mxu1 %v3431_v4 }
 0x646   :  { %2950 = vmatpush3.msra.mxu1 %v3431_v4 }
 0x647   :  { %2951 = vmatprep.subr.mxu1 %v3439_v39 }
 0x648   :  { %2952 = vmatpush3.msra.mxu1 %v3439_v39 }
 0x649   :  { %2953 = vmatprep.subr.mxu1 %v3456_v46 }
 0x64a   :  { %2954 = vmatpush3.msra.mxu1 %v3456_v46 }
 0x64b   :  { %2955 = vmatprep.subr.mxu1 %v3463_v13 }
 0x64c   :  { %2956 = vmatpush3.msra.mxu1 %v3463_v13 }
 0x6ed   :  { %v2910_v56 = vpop.f32.mrf.mxu1 }
 0x6ee   :  { %1433 = vperm.xlu0 %3084, %v2910_v56   ;;  %1409 = vperm.xlu1 %3083, %v2910_v56  }
 0x6ef   :  { %v1287_v58 = vpop.f32.mrf.mxu1 }
 0x6f2   :  { %3086 = vset.pattern.permute.xlu0 %v3138_v8  ;;  %3085 = vset.pattern.permute.xlu1 %v3139_v16 }
 0x6f3   :  { %1457 = vperm.xlu1 %3085, %v2910_v56   ;;  %1405 = vperm.xlu0 %3086, %v1287_v58   ;;  %v2913_v59 = vpop.f32.mrf.mxu1 }
 0x6f5   :  { %v1297_v54 = vpop.f32.mrf.mxu1 }
 0x6f7   :  { %3087 = vset.pattern.permute.xlu1 %v3137_v7  ;;  %1413 = vperm.xlu0 %3086, %v1297_v54  }
 0x6f8   :  { %1429 = vperm.xlu1 %3087, %v1287_v58  }
 0x6fb   :  { %3090 = vset.pattern.permute.xlu0 %v3137_v7 }
 0x6fc   :  { %3088 = vset.pattern.permute.xlu1 %v3139_v16  ;;  %1441 = vperm.xlu0 %3090, %v2913_v59  }
 0x6fd   :  { %1453 = vperm.xlu1 %3088, %v1287_v58  }
 0x6ff   :  { %v1372_v61 = vpop.f32.mrf.mxu0 }
 0x700   :  { %3093 = vset.pattern.permute.xlu0 %v3140_v21  ;;  %v1423_v0 = vrot.slane %v1372_v61, %v413_v24  ;;  %v1447_v29 = vrot.slane %v1372_v61, %v437_v26  ;;  %v1399_v47 = vrot.slane %v1372_v61, %v389_v19 }
 0x701   :  { %3089 = vset.pattern.permute.xlu1 %v3138_v8  ;;  %1378 = vperm.xlu0 %3093, %v1287_v58   ;;  %v2924_v63 = vpop.f32.mrf.mxu0 }
 0x702   :  { %1417 = vperm.xlu1 %3089, %v2913_v59  }
 0x705   :  { %1393 = vperm.xlu0 %3093, %v2913_v59  }
 0x706   :  { %3091 = vset.pattern.permute.xlu1 %v3137_v7  ;;  %v1471_v7 = vrot.slane %v1372_v61, %v461_v30 }
 0x707   :  { %1437 = vperm.xlu1 %3091, %v1297_v54  }
 0x70b   :  { %3092 = vset.pattern.permute.xlu1 %v3139_v16 }
 0x70c   :  { %1461 = vperm.xlu1 %3092, %v1297_v54  }
 0x710   :  { %1465 = vperm.xlu1 %3092, %v2913_v59  }
 0x714   :  { %3094 = vset.pattern.permute.xlu1 %v3140_v21 }
 0x715   :  { %1383 = vperm.xlu1 %3094, %v2910_v56  }
 0x719   :  { %1388 = vperm.xlu1 %3094, %v1297_v54  }
 0x769   :  { %v1434_v5 = vpop.permute.xlu0 %1433  ;;  %v1410_v60 = vpop.permute.xlu1 %1409 }
 0x76a   :  { %v1425_v31 = vadd.f32 %v1423_v0, %v1410_v60  ;;  %v1449_v16 = vadd.f32 %v1447_v29, %v1434_v5 }
 0x76c   :  { %1482 = vrot.lane.b32.xlu0 %v1425_v31, %s3145_s27 }
 0x76e   :  { %v1458_v4 = vpop.permute.xlu1 %1457  ;;  %v1406_v39 = vpop.permute.xlu0 %1405 }
 0x76f   :  { %v1424_v46 = vadd.f32 %v1423_v0, %v1406_v39  ;;  %v1473_v24 = vadd.f32 %v1471_v7, %v1458_v4 }
 0x770   :  { %1498 = vrot.lane.b32.xlu0 %v1449_v16, %s3146_s28 }
 0x771   :  { %1480 = vrot.lane.b32.xlu1 %v1424_v46, %s3145_s27 }
 0x772   :  { %v1414_v34 = vpop.permute.xlu0 %1413 }
 0x773   :  { %v1430_v13 = vpop.permute.xlu1 %1429  ;;  %v1426_v30 = vadd.f32 %v1423_v0, %v1414_v34 }
 0x774   :  { %v1448_v15 = vadd.f32 %v1447_v29, %v1430_v13  ;;  %1514 = vrot.lane.b32.xlu0 %v1473_v24, %s3147_s29 }
 0x776   :  { %1496 = vrot.lane.b32.xlu1 %v1448_v15, %s3146_s28 }
 0x777   :  { %v1442_v37 = vpop.permute.xlu0 %1441 }
 0x778   :  { %v1454_v26 = vpop.permute.xlu1 %1453  ;;  %v1451_v11 = vadd.f32 %v1447_v29, %v1442_v37 }
 0x779   :  { %v1472_v44 = vadd.f32 %v1471_v7, %v1454_v26 }
 0x77b   :  { %1512 = vrot.lane.b32.xlu1 %v1472_v44, %s3147_s29 }
 0x77c   :  { %v1379_v18 = vpop.permute.xlu0 %1378 }
 0x77d   :  { %v1418_v35 = vpop.permute.xlu1 %1417  ;;  %v1400_v20 = vadd.f32 %v1399_v47, %v1379_v18 }
 0x77e   :  { %v1427_v36 = vadd.f32 %v1423_v0, %v1418_v35 }
 0x77f   :  { %1484 = vrot.lane.b32.xlu1 %v1426_v30, %s3145_s27 }
 0x780   :  { %1486 = vrot.lane.b32.xlu0 %v1427_v36, %s3145_s27  ;;  %v1394_v43 = vpop.permute.xlu0 %1393 }
 0x781   :  { %v1403_v4 = vadd.f32 %v1399_v47, %v1394_v43 }
 0x782   :  { %v1438_v12 = vpop.permute.xlu1 %1437 }
 0x783   :  { %v1450_v9 = vadd.f32 %v1447_v29, %v1438_v12 }
 0x784   :  { %1502 = vrot.lane.b32.xlu0 %v1451_v11, %s3146_s28 }
 0x785   :  { %1500 = vrot.lane.b32.xlu1 %v1450_v9, %s3146_s28 }
 0x787   :  { %v1462_v10 = vpop.permute.xlu1 %1461 }
 0x788   :  { %v1474_v52 = vadd.f32 %v1471_v7, %v1462_v10 }
 0x78a   :  { %1516 = vrot.lane.b32.xlu1 %v1474_v52, %s3147_s29 }
 0x78b   :  { %v1466_v14 = vpop.permute.xlu1 %1465 }
 0x78c   :  { %v1475_v38 = vadd.f32 %v1471_v7, %v1466_v14 }
 0x78e   :  { %1518 = vrot.lane.b32.xlu0 %v1475_v38, %s3147_s29 }
 0x790   :  { %v1384_v42 = vpop.permute.xlu1 %1383 }
 0x791   :  { %v1401_v49 = vadd.f32 %v1399_v47, %v1384_v42 }
 0x794   :  { %v1389_v25 = vpop.permute.xlu1 %1388 }
 0x795   :  { %v1402_v29 = vadd.f32 %v1399_v47, %v1389_v25 }
 0x7de   :  { %v1483_v45 = vpop.permute.xlu0 %1482 }
 0x7df   :  { %v1525_v53 = vsel %vm68_vm2, %v1401_v49, %v1483_v45 }
 0x7e2   :  { %v1499_v48 = vpop.permute.xlu0 %1498 }
 0x7e3   :  { %v1481_v51 = vpop.permute.xlu1 %1480  ;;  %v1529_v57 = vsel %vm73_vm3, %v1525_v53, %v1499_v48 }
 0x7e4   :  { %v1524_v23 = vsel %vm68_vm2, %v1400_v20, %v1481_v51 }
 0x7e6   :  { %v1515_v1 = vpop.permute.xlu0 %1514 }
 0x7e7   :  { %v1533_v2 = vsel %vm78_vm4, %v1529_v57, %v1515_v1 }
 0x7e8   :  { %vm1537_vm9 = vcmp.gt.f32.partialorder %v1533_v2, 0.0  ;;  %v1541_v3 = vmul.f32 0.2, %v1533_v2  ;;  %v1497_v62 = vpop.permute.xlu1 %1496 }
 0x7e9   :  { %v1528_v19 = vsel %vm73_vm3, %v1524_v23, %v1497_v62 }
 0x7ea   :  { %v1545_v55 = vsel %vm1537_vm9, %v1533_v2, %v1541_v3 }
 0x7eb   :  { %v1549_v56 = vadd.f32 %v1545_v55, %v3340_v41 }
 0x7ed   :  { %v1513_v58 = vpop.permute.xlu1 %1512  ;;  %1554 = vmax.xlane.f32.xlu0 %v1549_v56 }
 0x7ee   :  { %v1532_v59 = vsel %vm78_vm4, %v1528_v19, %v1513_v58 }
 0x7ef   :  { %vm1536_vm10 = vcmp.gt.f32.partialorder %v1532_v59, 0.0  ;;  %v1540_v54 = vmul.f32 0.2, %v1532_v59 }
 0x7f1   :  { %v1544_v61 = vsel %vm1536_vm10, %v1532_v59, %v1540_v54  ;;  %v1485_v0 = vpop.permute.xlu1 %1484 }
 0x7f2   :  { %v1548_v63 = vadd.f32 %v1544_v61, %v3351_v50  ;;  %v1487_v5 = vpop.permute.xlu0 %1486  ;;  %v1526_v41 = vsel %vm68_vm2, %v1402_v29, %v1485_v0  ;;  %v15_v29 = vld [vmem:[%s3785_s0] sm:$0xff] }
 0x7f3   :  { %v1527_v24 = vsel %vm68_vm2, %v1403_v4, %v1487_v5 }
 0x7f4   :  { %1552 = vmax.xlane.f32.xlu1 %v1548_v63 }
 0x7f6   :  { %v1503_v31 = vpop.permute.xlu0 %1502 }
 0x7f7   :  { %v1501_v60 = vpop.permute.xlu1 %1500  ;;  %v1531_v50 = vsel %vm73_vm3, %v1527_v24, %v1503_v31 }
 0x7f8   :  { %v1530_v7 = vsel %vm73_vm3, %v1526_v41, %v1501_v60 }
 0x7fc   :  { %v1517_v16 = vpop.permute.xlu1 %1516 }
 0x7fd   :  { %v1534_v39 = vsel %vm78_vm4, %v1530_v7, %v1517_v16 }
 0x7fe   :  { %vm1538_vm11 = vcmp.gt.f32.partialorder %v1534_v39, 0.0  ;;  %v1542_v46 = vmul.f32 0.2, %v1534_v39 }
 0x800   :  { %v1519_v13 = vpop.permute.xlu0 %1518  ;;  %v1546_v15 = vsel %vm1538_vm11, %v1534_v39, %v1542_v46 }
 0x801   :  { %v1535_v26 = vsel %vm78_vm4, %v1531_v50, %v1519_v13  ;;  %v1550_v34 = vadd.f32 %v1546_v15, %v3442_v40 }
 0x802   :  { %vm1539_vm12 = vcmp.gt.f32.partialorder %v1535_v26, 0.0  ;;  %v1543_v44 = vmul.f32 0.2, %v1535_v26 }
 0x803   :  { %1556 = vmax.xlane.f32.xlu0 %v1550_v34 }
 0x804   :  { %v1547_v30 = vsel %vm1539_vm12, %v1535_v26, %v1543_v44  ;;  %v97_v44 = vld [vmem:[%s3784_s1 + $0x68] sm:$0xff] }
 0x805   :  { %v1551_v35 = vadd.f32 %v1547_v30, %v3466_v17  ;;  %v96_v30 = vld [vmem:[%s3784_s1 + $0x60] sm:$0xff] }
 0x807   :  { %1558 = vmax.xlane.f32.xlu1 %v1551_v35 }
 0x818   :  { %1689 = vrot.lane.b32.xlu1 %v3569_v28, %s3147_s29 }
 0x819   :  { %1691 = vrot.lane.b32.xlu0 %v3564_v33, %s3147_s29 }
 0x81c   :  { %1687 = vrot.lane.b32.xlu1 %v3557_v27, %s3147_s29 }
 0x81d   :  { %1685 = vrot.lane.b32.xlu0 %v3559_v32, %s3147_s29 }
 0x820   :  { %1897 = vrot.lane.b32.xlu1 %v3564_v33, %s3146_s28 }
 0x821   :  { %1895 = vrot.lane.b32.xlu0 %v3569_v28, %s3146_s28 }
 0x824   :  { %2014 = vrot.lane.b32.xlu1 %v3564_v33, %s3145_s27 }
 0x825   :  { %1893 = vrot.lane.b32.xlu0 %v3557_v27, %s3146_s28 }
 0x828   :  { %2012 = vrot.lane.b32.xlu1 %v3569_v28, %s3145_s27 }
 0x829   :  { %1891 = vrot.lane.b32.xlu0 %v3559_v32, %s3146_s28 }
 0x876   :  { %v1555_v40 = vpop.xlane.xlu0 %1554 }
 0x877   :  { %v1561_v17 = vsub.f32 %v1549_v56, %v1555_v40 }
 0x879   :  { %v1566_v11 = vmul.f32 1.442695, %v1561_v17 }
 0x87d   :  { %v1553_v36 = vpop.xlane.xlu1 %1552 }
 0x87e   :  { %v1560_v37 = vsub.f32 %v1548_v63, %v1553_v36 }
 0x880   :  { %v1564_v12 = vmul.f32 1.442695, %v1560_v37 }
 0x882   :  { %3113 = vpow2.f32 %v1564_v12 }
 0x883   :  { %3115 = vpow2.f32 %v1566_v11 }
 0x88c   :  { %v1557_v9 = vpop.xlane.xlu0 %1556 }
 0x88d   :  { %v1562_v10 = vsub.f32 %v1550_v34, %v1557_v9 }
 0x88f   :  { %v3114_v52 = vpop.eup %3113  ;;  %v1568_v14 = vmul.f32 1.442695, %v1562_v10 }
 0x890   :  { %v3116_v38 = vpop.eup %3115  ;;  %2957 = vmatprep.mubr.f32.mxu1 %v3114_v52  ;;  %v1559_v18 = vpop.xlane.xlu1 %1558 }
 0x891   :  { %v1692_v42 = vpop.permute.xlu0 %1691  ;;  %3117 = vpow2.f32 %v1568_v14  ;;  %v1563_v43 = vsub.f32 %v1551_v35, %v1559_v18  ;;  %2958 = vmatmul.mubr.f32.vlgmr.msra.gmra.mxu1 %v3116_v38  ;;  %v95_v35 = vld [vmem:[%s3784_s1 + $0x58] sm:$0xff] }
 0x892   :  { %2963 = vmatprep.subr.mxu0 %v1692_v42 }
 0x893   :  { %2964 = vmatpush3.msra.mxu0 %v1692_v42  ;;  %v1570_v45 = vmul.f32 1.442695, %v1563_v43 }
 0x894   :  { %v1690_v25 = vpop.permute.xlu1 %1689 }
 0x895   :  { %3119 = vpow2.f32 %v1570_v45  ;;  %2965 = vmatprep.subr.mxu0 %v1690_v25  ;;  %v1686_v48 = vpop.permute.xlu0 %1685 }
 0x896   :  { %2966 = vmatpush3.msra.mxu0 %v1690_v25 }
 0x898   :  { %v1688_v47 = vpop.permute.xlu1 %1687 }
 0x899   :  { %2967 = vmatprep.subr.mxu0 %v1688_v47  ;;  %v1896_v41 = vpop.permute.xlu0 %1895 }
 0x89a   :  { %2968 = vmatpush3.msra.mxu0 %v1688_v47 }
 0x89b   :  { %2969 = vmatprep.subr.mxu0 %v1686_v48 }
 0x89c   :  { %v3676_v49 = vpop.permute.xlu1 %1897  ;;  %2970 = vmatpush3.msra.mxu0 %v1686_v48 }
 0x89d   :  { %2977 = vmatprep.subr.mxu0 %v3564_v33  ;;  %v1894_v31 = vpop.permute.xlu0 %1893 }
 0x89e   :  { %v3118_v51 = vpop.eup %3117 }
 0x89f   :  { %2960 = vmatprep.mubr.f32.mxu1 %v3118_v51 }
 0x8a0   :  { %v2015_v53 = vpop.permute.xlu1 %2014 }
 0x8a1   :  { %3005 = vmatprep.subr.mxu1 %v2015_v53  ;;  %v1892_v7 = vpop.permute.xlu0 %1891 }
 0x8a2   :  { %v3120_v57 = vpop.eup %3119  ;;  %3006 = vmatpush3.msra.mxu1 %v2015_v53 }
 0x8a3   :  { %2961 = vmatmul.mubr.f32.gmra.mxu1 %v3120_v57 }
 0x8a4   :  { %v2013_v1 = vpop.permute.xlu1 %2012 }
 0x8a5   :  { %3007 = vmatprep.subr.mxu1 %v2013_v1 }
 0x8a6   :  { %3008 = vmatpush3.msra.mxu1 %v2013_v1 }
 0x951   :  { %v2959_v2 = vpop.f32.mrf.mxu1 }
 0x952   :  { %v1658_v3 = vmax.f32 %v2959_v2, 1e-30 }
 0x953   :  { %v1638_v62 = vpop.f32.mrf.mxu1 }
 0x954   :  { %3121 = vrcp.f32 %v1658_v3  ;;  %v1657_v20 = vmax.f32 %v1638_v62, 1e-30 }
 0x956   :  { %3123 = vrcp.f32 %v1657_v20 }
 0x961   :  { %v3122_v55 = vpop.eup %3121 }
 0x962   :  { %v1664_v56 = vmul.f32 %v3122_v55, %v3116_v38 }
 0x963   :  { %v3124_v23 = vpop.eup %3123  ;;  %v2962_v19 = vpop.f32.mrf.mxu1 }
 0x964   :  { %v1660_v58 = vmax.f32 %v2962_v19, 1e-30  ;;  %1675 = vrot.lane.b32.xlu0 %v1664_v56, %s3147_s29  ;;  %v1662_v59 = vmul.f32 %v3124_v23, %v3114_v52  ;;  %v2609_v19 = vld [vmem:[%s3784_s1 + $0x49] ss:$0 sm:$0xff] }
 0x965   :  { %v1648_v54 = vpop.f32.mrf.mxu1 }
 0x966   :  { %3125 = vrcp.f32 %v1660_v58  ;;  %v1659_v61 = vmax.f32 %v1648_v54, 1e-30  ;;  %1673 = vrot.lane.b32.xlu1 %v1662_v59, %s3147_s29 }
 0x968   :  { %3127 = vrcp.f32 %v1659_v61 }
 0x973   :  { %v3126_v63 = vpop.eup %3125 }
 0x974   :  { %v1668_v0 = vmul.f32 %v3126_v63, %v3120_v57 }
 0x975   :  { %v3128_v5 = vpop.eup %3127 }
 0x976   :  { %1679 = vrot.lane.b32.xlu0 %v1668_v0, %s3147_s29  ;;  %v1666_v60 = vmul.f32 %v3128_v5, %v3118_v51 }
 0x978   :  { %1677 = vrot.lane.b32.xlu1 %v1666_v60, %s3147_s29 }
 0x97a   :  { %1883 = vrot.lane.b32.xlu0 %v1662_v59, %s3146_s28 }
 0x97c   :  { %2010 = vrot.lane.b32.xlu1 %v3557_v27, %s3145_s27 }
 0x97e   :  { %2008 = vrot.lane.b32.xlu0 %v3559_v32, %s3145_s27 }
 0x980   :  { %1885 = vrot.lane.b32.xlu1 %v1664_v56, %s3146_s28 }
 0x982   :  { %2002 = vrot.lane.b32.xlu0 %v1664_v56, %s3145_s27 }
 0x984   :  { %2000 = vrot.lane.b32.xlu1 %v1662_v59, %s3145_s27 }
 0x986   :  { %1889 = vrot.lane.b32.xlu0 %v1668_v0, %s3146_s28 }
 0x988   :  { %1887 = vrot.lane.b32.xlu1 %v1666_v60, %s3146_s28 }
 0x98a   :  { %2006 = vrot.lane.b32.xlu0 %v1668_v0, %s3145_s27 }
 0x98c   :  { %2004 = vrot.lane.b32.xlu1 %v1666_v60, %s3145_s27 }
 0x990   :  { %2134 = vrot.lane.b32.xlu1 %v15_v29, %s3144_s26 }
 0x9d6   :  { %v1676_v4 = vpop.permute.xlu0 %1675 }
 0x9d8   :  { %v1674_v16 = vpop.permute.xlu1 %1673 }
 0x9d9   :  { %2971 = vmatprep.mubr.msk.f32.mxu0 %vm68_vm2, %v1674_v16 }
 0x9da   :  { %2972 = vmatmul.mubr.msk.f32.vlgmr.msra.gmra.mxu0 %vm68_vm2, %v1676_v4 }
 0x9db   :  { %2978 = vmatpush3.msra.mxu0 %v3564_v33 }
 0x9dc   :  { %2979 = vmatprep.subr.mxu0 %v3569_v28 }
 0x9dd   :  { %2980 = vmatpush3.msra.mxu0 %v3569_v28 }
 0x9de   :  { %2981 = vmatprep.subr.mxu0 %v3557_v27 }
 0x9df   :  { %2982 = vmatpush3.msra.mxu0 %v3557_v27 }
 0x9e0   :  { %2983 = vmatprep.subr.mxu0 %v3559_v32 }
 0x9e1   :  { %2984 = vmatpush3.msra.mxu0 %v3559_v32 }
 0x9e2   :  { %2991 = vmatprep.subr.mxu0 %v3676_v49 }
 0x9e8   :  { %v1680_v39 = vpop.permute.xlu0 %1679 }
 0x9ea   :  { %v1678_v46 = vpop.permute.xlu1 %1677 }
 0x9eb   :  { %2974 = vmatprep.mubr.msk.f32.mxu0 %vm68_vm2, %v1678_v46  ;;  %v2611_v46 = vld [vmem:[%s3784_s1 + $0x70] ss:$0 sm:$0xff] }
 0x9ec   :  { %2975 = vmatmul.mubr.msk.f32.gmra.mxu0 %vm68_vm2, %v1680_v39  ;;  %v1884_v33 = vpop.permute.xlu0 %1883  ;;  %v99_v39 = vld [vmem:[%s3784_s1 + $0x78] sm:$0x3] }
 0x9ed   :  { %2985 = vmatprep.mubr.msk.f32.mxu0 %vm68_vm2, %v1662_v59 }
 0x9ee   :  { %v2011_v28 = vpop.permute.xlu1 %2010 }
 0x9ef   :  { %3009 = vmatprep.subr.mxu1 %v2011_v28 }
 0x9f0   :  { %2986 = vmatmul.mubr.msk.f32.vlgmr.msra.gmra.mxu0 %vm68_vm2, %v1664_v56  ;;  %3010 = vmatpush3.msra.mxu1 %v2011_v28  ;;  %v2009_v27 = vpop.permute.xlu0 %2008 }
 0x9f1   :  { %2992 = vmatpush3.msra.mxu0 %v3676_v49  ;;  %2988 = vmatprep.mubr.msk.f32.mxu0 %vm68_vm2, %v1666_v60 }
 0x9f2   :  { %2993 = vmatprep.subr.mxu0 %v1896_v41  ;;  %3011 = vmatprep.subr.mxu1 %v2009_v27  ;;  %v1886_v32 = vpop.permute.xlu1 %1885 }
 0x9f3   :  { %2994 = vmatpush3.msra.mxu0 %v1896_v41  ;;  %3012 = vmatpush3.msra.mxu1 %v2009_v27 }
 0x9f4   :  { %2995 = vmatprep.subr.mxu0 %v1894_v31  ;;  %2989 = vmatmul.mubr.msk.f32.gmra.mxu0 %vm68_vm2, %v1668_v0  ;;  %v2003_v24 = vpop.permute.xlu0 %2002 }
 0x9f5   :  { %2996 = vmatpush3.msra.mxu0 %v1894_v31  ;;  %2999 = vmatprep.mubr.msk.f32.mxu0 %vm68_vm2, %v1884_v33 }
 0x9f6   :  { %2997 = vmatprep.subr.mxu0 %v1892_v7  ;;  %v2001_v50 = vpop.permute.xlu1 %2000  ;;  %3030 = vmatprep.subr.mxu1 %v3135_v6 }
 0x9f7   :  { %2998 = vmatpush3.msra.mxu0 %v1892_v7  ;;  %3013 = vmatprep.mubr.msk.f32.mxu1 %vm68_vm2, %v2001_v50  ;;  %v94_v7 = vld [vmem:[%s3784_s1 + $0x50] sm:$0xff] }
 0x9f8   :  { %3000 = vmatmul.mubr.msk.f32.vlgmr.msra.gmra.mxu0 %vm68_vm2, %v1886_v32  ;;  %3014 = vmatmul.mubr.msk.f32.vlgmr.msra.gmra.mxu1 %vm68_vm2, %v2003_v24  ;;  %v1890_v13 = vpop.permute.xlu0 %1889  ;;  %v2613_v24 = vld [vmem:[%s3784_s1 + $0x80] ss:$0 sm:$0xff] }
 0x9f9   :  { %3019 = vmatprep.subr.mxu0 %v3135_v6  ;;  %3031 = vmatpush3.msra.mxu1 %v97_v44 }
 0x9fa   :  { %v1888_v15 = vpop.permute.xlu1 %1887  ;;  %3032 = vmatprep.subr.mxu1 %v3135_v6 }
 0x9fb   :  { %3002 = vmatprep.mubr.msk.f32.mxu0 %vm68_vm2, %v1888_v15  ;;  %3033 = vmatpush3.msra.mxu1 %v96_v30 }
 0x9fc   :  { %3003 = vmatmul.mubr.msk.f32.gmra.mxu0 %vm68_vm2, %v1890_v13  ;;  %v2007_v34 = vpop.permute.xlu0 %2006  ;;  %3034 = vmatprep.subr.mxu1 %v3135_v6 }
 0x9fd   :  { %3027 = vmatprep.mubr.msk.f32.mxu0 %vm3136_vm1, %v3135_v6  ;;  %3035 = vmatpush3.msra.mxu1 %v95_v35 }
 0x9fe   :  { %v2005_v26 = vpop.permute.xlu1 %2004  ;;  %3036 = vmatprep.subr.mxu1 %v3135_v6 }
 0x9ff   :  { %3016 = vmatprep.mubr.msk.f32.mxu1 %vm68_vm2, %v2005_v26  ;;  %3037 = vmatpush3.msra.mxu1 %v94_v7 }
 0xa00   :  { %3017 = vmatmul.mubr.msk.f32.gmra.mxu1 %vm68_vm2, %v2007_v34  ;;  %3046 = vmatprep.subr.mxu1 %v3135_v6 }
 0xa01   :  { %3038 = vmatprep.mubr.msk.f32.mxu1 %vm3136_vm1, %v3135_v6 }
 0xa02   :  { %v2135_v31 = vpop.permute.xlu1 %2134 }
 0xa9a   :  { %v2973_v40 = vpop.f32.mrf.mxu0 }
 0xa9c   :  { %v1771_v17 = vpop.f32.mrf.mxu0 }
 0xaac   :  { %v2976_v36 = vpop.f32.mrf.mxu0 }
 0xaae   :  { %v1781_v37 = vpop.f32.mrf.mxu0 }
 0xab0   :  { %v2987_v11 = vpop.f32.mrf.mxu0 }
 0xab1   :  { %v1870_v14 = vadd.f32 %v2987_v11, %v2973_v40 }
 0xab2   :  { %v1864_v12 = vpop.f32.mrf.mxu0 }
 0xab3   :  { %v1865_v42 = vadd.f32 %v1864_v12, %v1771_v17 }
 0xab4   :  { %v2990_v9 = vpop.f32.mrf.mxu0 }
 0xab5   :  { %v1880_v25 = vadd.f32 %v2990_v9, %v2976_v36 }
 0xab6   :  { %v1874_v10 = vpop.f32.mrf.mxu0 }
 0xab7   :  { %v1875_v51 = vadd.f32 %v1874_v10, %v1781_v37 }
 0xab8   :  { %v3001_v52 = vpop.f32.mrf.mxu0  ;;  %v3015_v38 = vpop.f32.mrf.mxu1 }
 0xab9   :  { %v1997_v43 = vadd.f32 %v3001_v52, %v1870_v14 }
 0xaba   :  { %v1977_v18 = vpop.f32.mrf.mxu0  ;;  %v2094_v48 = vpop.f32.mrf.mxu1 }
 0xabb   :  { %v1996_v47 = vadd.f32 %v1977_v18, %v1865_v42  ;;  %v2114_v53 = vadd.f32 %v3015_v38, %v1997_v43 }
 0xabc   :  { %v3004_v45 = vpop.f32.mrf.mxu0 }
 0xabd   :  { %v1999_v57 = vadd.f32 %v3004_v45, %v1880_v25  ;;  %v2113_v2 = vadd.f32 %v2094_v48, %v1996_v47  ;;  %v2118_v55 = vmul.f32 0.25, %v2114_v53  ;;  %v2532_v48 = vand.u32 127, %v387_v22 }
 0xabe   :  { %v1987_v49 = vpop.f32.mrf.mxu0 }
 0xabf   :  { %v1998_v3 = vadd.f32 %v1987_v49, %v1875_v51  ;;  %v2117_v58 = vmul.f32 0.25, %v2113_v2  ;;  %v2126_v61 = vadd.f32 %v2609_v19, %v2118_v55  ;;  %vm2540_vm14 = vcmp.eq.s32.totalorder %v2532_v48, 1 }
 0xac0   :  { %v3018_v1 = vpop.f32.mrf.mxu1  ;;  %vm2533_vm15 = vcmp.eq.s32.totalorder %v2532_v48, 0 }
 0xac1   :  { %v2116_v62 = vadd.f32 %v3018_v1, %v1999_v57  ;;  %v2125_v5 = vadd.f32 %v2609_v19, %v2117_v58  ;;  %v2130_v29 = vmax.f32 %v2126_v61, 0.0 }
 0xac2   :  { %v2104_v20 = vpop.f32.mrf.mxu1 }
 0xac3   :  { %v2120_v56 = vmul.f32 0.25, %v2116_v62  ;;  %v2115_v23 = vadd.f32 %v2104_v20, %v1998_v3  ;;  %v2129_v41 = vmax.f32 %v2125_v5, 0.0 }
 0xac5   :  { %v2128_v59 = vadd.f32 %v2609_v19, %v2120_v56  ;;  %v2119_v54 = vmul.f32 0.25, %v2115_v23 }
 0xac7   :  { %v2132_v63 = vmax.f32 %v2128_v59, 0.0  ;;  %v2127_v0 = vadd.f32 %v2609_v19, %v2119_v54 }
 0xac9   :  { %v2131_v60 = vmax.f32 %v2127_v0, 0.0  ;;  %3020 = vmatpush3.msra.mxu0 %v2132_v63 }
 0xaca   :  { %3021 = vmatprep.subr.mxu0 %v3135_v6 }
 0xacb   :  { %3022 = vmatpush3.msra.mxu0 %v2131_v60 }
 0xacc   :  { %3023 = vmatprep.subr.mxu0 %v3135_v6 }
 0xacd   :  { %3024 = vmatpush3.msra.mxu0 %v2130_v29 }
 0xace   :  { %3025 = vmatprep.subr.mxu0 %v3135_v6 }
 0xacf   :  { %3026 = vmatpush3.msra.mxu0 %v2129_v41 }
 0xad0   :  { %3028 = vmatmul.mubr.msk.f32.vlgmr.msra.gmra.mxu0 %vm68_vm2, %v2135_v31  ;;  %3041 = vmatprep.subr.mxu0 %v3135_v6 }
 0xad1   :  { %3043 = vmatprep.mubr.msk.f32.mxu0 %vm3136_vm1, %v3135_v6  ;;  %3042 = vmatpush3.xpose.msk.msra.mxu0 %vm73_vm3, %v99_v39 }
 0xad2   :  { %3051 = vmatprep.subr.mxu0 %v3135_v6 }
 0xb90   :  { %v2204_v16 = vpop.f32.mrf.mxu0 }
 0xb91   :  { %3039 = vmatmul.mubr.msk.f32.vlgmr.msra.gmra.mxu1 %vm68_vm2, %v2204_v16  ;;  %vm2555_vm2 = vcmp.eq.s32.totalorder %v2532_v48, 3 }
 0xb92   :  { %v3029_v4 = vpop.f32.mrf.mxu0  ;;  %3048 = vmatprep.mubr.msk.f32.mxu1 %vm3136_vm1, %v3135_v6 }
 0xc51   :  { %v2281_v33 = vpop.f32.mrf.mxu1 }
 0xc52   :  { %v2282_v28 = vadd.f32 %v2611_v46, %v2281_v33 }
 0xc53   :  { %v3040_v27 = vpop.f32.mrf.mxu1 }
 0xc54   :  { %v2285_v32 = vmax.f32 %v2282_v28, 0.0 }
 0xc56   :  { %3044 = vmatmul.mubr.msk.f32.vlgmr.msra.gmra.mxu0 %vm73_vm3, %v2285_v32 }
 0xc57   :  { %3053 = vmatprep.mubr.msk.f32.mxu0 %vm3136_vm1, %v3135_v6  ;;  %vm2547_vm1 = vcmp.eq.s32.totalorder %v2532_v48, 2 }
 0xd16   :  { %v2362_v50 = vpop.f32.mrf.mxu0 }
 0xd17   :  { %v2363_v13 = vadd.f32 %v2613_v24, %v2362_v50 }
 0xd18   :  { %v3045_v15 = vpop.f32.mrf.mxu0 }
 0xd19   :  { %2536 = vperm.xlu1 %3094, %v2363_v13   ;;  %v2367_v26 = vsel %vm2366_vm13, %v2363_v13, -inf }
 0xd1a   :  { %2368 = vmax.xlane.f32.xlu0 %v2367_v26 }
 0xd1d   :  { %3095 = vset.pattern.permute.xlu1 %v3138_v8  ;;  %v117_v8 = vld [vmem:[%s3784_s1 + $0x108] sm:$0xff] }
 0xd1e   :  { %2542 = vperm.xlu1 %3095, %v2363_v13  }
 0xd22   :  { %3096 = vset.pattern.permute.xlu1 %v3140_v21 }
 0xd94   :  { %v2537_v47 = vpop.permute.xlu1 %2536 }
 0xd95   :  { %v2539_v57 = vsel %vm2533_vm15, %v2537_v47, 0.0 }
 0xd99   :  { %v2543_v49 = vpop.permute.xlu1 %2542 }
 0xd9a   :  { %v2545_v53 = vsel %vm2540_vm14, %v2543_v49, 0.0 }
 0xd9b   :  { %v2546_v2 = vadd.f32 %v2545_v53, %v2539_v57 }
 0xda3   :  { %v2369_v34 = vpop.xlane.xlu0 %2368 }
 0xda4   :  { %v2370_v44 = vrot.slane %v2369_v34, 4 }
 0xda6   :  { %v2371_v30 = vmax.f32 %v2369_v34, %v2370_v44 }
 0xda8   :  { %v2372_v6 = vrot.slane %v2371_v30, 2 }
 0xdaa   :  { %v2373_v35 = vmax.f32 %v2371_v30, %v2372_v6 }
 0xdac   :  { %v2374_v40 = vrot.slane %v2373_v35, 1 }
 0xdae   :  { %v2375_v17 = vmax.f32 %v2373_v35, %v2374_v40 }
 0xdb0   :  { %3056 = vpush %v2375_v17 }
 0xde1   :  { %s3057_s13 = spop %3056 }
 0xde2   :  { %v2377_v36 = vstv %s3057_s13 }
 0xde3   :  { %v2378_v37 = vsub.f32 %v2363_v13, %v2377_v36 }
 0xde5   :  { %v2379_v11 = vmul.f32 1.442695, %v2378_v37 }
 0xde7   :  { %3129 = vpow2.f32 %v2379_v11 }
 0xdf4   :  { %v3130_v12 = vpop.eup %3129 }
 0xdf5   :  { %3047 = vmatpush3.msra.mxu1 %v3130_v12 }
 0xdf6   :  { %3049 = vmatmul.mubr.msk.f32.vlgmr.msra.gmra.mxu1 %vm118_vm0, %v117_v8 }
 0xeb6   :  { %v2450_v21 = vpop.f32.mrf.mxu1 }
 0xeb7   :  { %3131 = vlog2.f32 %v2450_v21 }
 0xeb8   :  { %v3050_v9 = vpop.f32.mrf.mxu1 }
 0xec4   :  { %v3132_v10 = vpop.eup %3131 }
 0xec5   :  { %v2455_v52 = vmul.f32 0.6931472, %v3132_v10 }
 0xec7   :  { %v2456_v14 = vsub.f32 %v2378_v37, %v2455_v52 }
 0xec9   :  { %v2457_v38 = vmul.f32 1.442695, %v2456_v14  ;;  %2550 = vperm.xlu1 %3096, %v2456_v14  }
 0xecb   :  { %3133 = vpow2.f32 %v2457_v38 }
 0xed8   :  { %v3134_v18 = vpop.eup %3133 }
 0xed9   :  { %v2459_v42 = vmul.f32 %v3134_v18, %v2456_v14 }
 0xedb   :  { %3052 = vmatpush3.msra.mxu0 %v2459_v42 }
 0xedc   :  { %3054 = vmatmul.mubr.msk.f32.vlgmr.msra.gmra.mxu0 %vm118_vm0, %v117_v8 }
 0xf44   :  { %v2551_v51 = vpop.permute.xlu1 %2550 }
 0xf45   :  { %v2553_v1 = vsel %vm2547_vm1, %v2551_v51, 0.0 }
 0xf46   :  { %v2554_v3 = vadd.f32 %v2553_v1, %v2546_v2 }
 0xf9c   :  { %v2526_v43 = vpop.f32.mrf.mxu0 }
 0xf9d   :  { %v2530_v45 = vsub.f32 0.0, %v2526_v43 }
 0xf9e   :  { %v3055_v25 = vpop.f32.mrf.mxu0 }
 0xf9f   :  { %2558 = vperm.xlu1 %3096, %v2530_v45  }
0x101a   :  { %v2559_v62 = vpop.permute.xlu1 %2558 }
0x101b   :  { %v2561_v20 = vsel %vm2555_vm2, %v2559_v62, 0.0 }
0x101c   :  { %v2562_v55 = vadd.f32 %v2561_v20, %v2554_v3 }
0x101e   :  { %2563 = vst [vmem:[%s3786_s2] sm:$0xff] %v2562_v55 }

</bundles_post_ra>
